<compile_context>
chip_gen: v7x
topology: tpu7x:2x2x1
jax: 0.10.0
libtpu: 0.0.40
codegen_flags: <defaults>
</compile_context>

<pallas_src>
import functools

import jax
import jax.numpy as jnp
from jax import lax
from jax.experimental import pallas as pl
from jax.experimental.pallas import tpu as pltpu


def _round_up(x, m):
    return ((x + m - 1) // m) * m


# ----------------------------------------------------------------------------
# Pallas kernel: fused conv1(+folded conv2) -> conv3 -> conv4, one image per
# grid step.  All convs are "valid" (stride 1, no padding).
# ----------------------------------------------------------------------------
def _fused_conv_chain_kernel(x_ref, w1_ref, b1_ref, w3_ref, b3_ref,
                             w4_ref, b4_ref, o_ref, sum_ref, t3_ref,
                             *, SW, L1, L3, L4OUT):
    """Channel-major fused conv chain.  Activations are (Cpad, Lflat) with
    flat position p = h*SW + w; weights come pre-packed as
    (KH, Cout_pad, KW*Cin_pad); biases as (Cout_pad, 1)."""

    def conv_stage(src_ref, w_ref, b_ref, KH, KW, L):
        cout = w_ref.shape[1]
        acc = jnp.zeros((cout, L), jnp.float32)
        for kh in range(KH):                              # static -> unrolled
            # Stack the KW row-shifted slices along the (8-aligned) channel
            # axis -> one matmul per kh with K = KW * Cin_pad.
            lhs = jnp.concatenate(
                [src_ref[:, pl.ds(kh * SW + kw, L)] for kw in range(KW)],
                axis=0)                                   # (KW*Cin_pad, L)
            acc = acc + jnp.dot(w_ref[kh], lhs,
                                preferred_element_type=jnp.float32)
        return acc + b_ref[...]                           # (Cout, 1) broadcast

    # Zero t3 so the lane-padded columns read by stage 3 are defined zeros.
    t3_ref[...] = jnp.zeros(t3_ref.shape, jnp.float32)
    # Stage 1: conv1 2x2 (16p -> 24p channels), conv2 folded into its (0,0) tap.
    sum_ref[...] = conv_stage(x_ref, w1_ref, b1_ref, 2, 2, L1)
    # Stage 2: conv3 4x4 (24p -> 8p channels), valid flat span only.
    t3_ref[:, :L3] = conv_stage(sum_ref, w3_ref, b3_ref, 4, 4, L3)
    # Stage 3: conv4 6x6 (8p -> 10 channels), computed over the lane-padded
    # span so the final store is one full, unmasked, lane-dense block.
    o_ref[...] = conv_stage(t3_ref, w4_ref, b4_ref, 6, 6, L4OUT).astype(o_ref.dtype)


@jax.jit
def model_tanh_forward(x_nchw, params):
    """Forward pass of ModelTanh.  x_nchw: (N, 10, H, W) float32, NCHW."""
    w1, b1, w2, b2, w3, b3, w4, b4 = params
    x = x_nchw.astype(jnp.float32)
    N, Cin, H, W = x.shape
    K1, K3, K4 = w1.shape[0], w3.shape[0], w4.shape[0]        # 2, 4, 6
    C1, C3, C4 = w1.shape[-1], w3.shape[-1], w4.shape[-1]     # 20, 5, 10

    Ho1, Wo1 = H - K1 + 1, W - K1 + 1
    Ho3, Wo3 = Ho1 - K3 + 1, Wo1 - K3 + 1
    Ho4, Wo4 = Ho3 - K4 + 1, Wo3 - K4 + 1

    SW = W                                  # flat row stride, kept through all stages
    L1 = (Ho1 - 1) * SW + Wo1               # valid flat spans
    L3 = (Ho3 - 1) * SW + Wo3
    L4OUT = _round_up(Ho4 * SW, 128)        # lane-dense final span (full rows + pad)
    Lt3 = _round_up(max(L3, L4OUT + (K4 - 1) * (SW + 1)), 128)

    # In-bounds guarantees (shifted-slice reads never leave their source refs).
    assert L1 + (K1 - 1) * (SW + 1) <= H * W
    assert L3 + (K3 - 1) * (SW + 1) <= L1
    assert L4OUT + (K4 - 1) * (SW + 1) <= Lt3
    assert Ho4 * SW <= L4OUT

    # 8-aligned channel padding: keeps every stacked-slice concat on the
    # sublane-aligned fast path; padded channels are exact zero-multiplies.
    C0p, C1p, C3p = _round_up(Cin, 8), _round_up(C1, 8), _round_up(C3, 8)

    # Fold conv2 (1x1 over first 3 channels, output cropped to t1) into
    # conv1's (kh=0, kw=0) tap -- exactly equivalent to t1 + t2_cropped.
    w1f = w1.at[0, 0, :3, :].add(w2[0, 0])

    def prep_w(w, cin_p, cout_p):
        """HWIO -> zero-padded channel-major (KH, Cout_p, KW*Cin_p)."""
        kh, kw, ci, co = w.shape
        w = jnp.pad(w, ((0, 0), (0, 0), (0, cin_p - ci), (0, cout_p - co)))
        return jnp.transpose(w, (0, 3, 1, 2)).reshape(kh, cout_p, kw * cin_p)

    w1t = prep_w(w1f, C0p, C1p)
    w3t = prep_w(w3, C1p, C3p)
    w4t = prep_w(w4, C3p, C4)
    b1c = jnp.pad(b1 + b2, (0, C1p - C1)).reshape(C1p, 1)
    b3c = jnp.pad(b3, (0, C3p - C3)).reshape(C3p, 1)
    b4c = b4.reshape(C4, 1)

    # Channel-major flat activations straight from NCHW (no transpose); the
    # only input-side prep is the cheap zero-pad of the channel axis.
    x_flat = jnp.pad(x.reshape(N, Cin, H * W), ((0, 0), (0, C0p - Cin), (0, 0)))

    full = lambda a: pl.BlockSpec(a.shape, lambda n: (0,) * a.ndim)
    kernel = functools.partial(_fused_conv_chain_kernel,
                               SW=SW, L1=L1, L3=L3, L4OUT=L4OUT)

    out_flat = pl.pallas_call(
        kernel,
        out_shape=jax.ShapeDtypeStruct((N, C4, L4OUT), jnp.float32),
        grid_spec=pltpu.PrefetchScalarGridSpec(
            num_scalar_prefetch=0,
            grid=(N,),                      # one image per step; N=2 parallel
            in_specs=[                      #   blocks keep both v7x TCs busy
                pl.BlockSpec((None, C0p, H * W), lambda n: (n, 0, 0)),
                full(w1t), full(b1c),
                full(w3t), full(b3c),
                full(w4t), full(b4c),
            ],
            out_specs=pl.BlockSpec((None, C4, L4OUT), lambda n: (n, 0, 0)),
            scratch_shapes=[
                pltpu.VMEM((C1p, L1), jnp.float32),    # t1 + t2 (channel-major)
                pltpu.VMEM((C3p, Lt3), jnp.float32),   # t3 (channel-major, padded)
            ],
        ),
        compiler_params=pltpu.CompilerParams(
            dimension_semantics=("parallel",)),
    )(x_flat, w1t, b1c, w3t, b3c, w4t, b4c)

    # Output is already NCHW / channel-major: slice full rows, un-flatten,
    # crop the garbage width tail.
    return out_flat[:, :, :Ho4 * SW].reshape(N, C4, Ho4, SW)[:, :, :, :Wo4]


# ----------------------------------------------------------------------------
# Pure-JAX reference (same reconciliation, unfused) for a correctness check.
# ----------------------------------------------------------------------------
def _ref_forward(x_nchw, params):
    w1, b1, w2, b2, w3, b3, w4, b4 = params
    x = jnp.transpose(x_nchw, (0, 2, 3, 1)).astype(jnp.float32)
    dn = ("NHWC", "HWIO", "NHWC")
    conv = lambda a, w: lax.conv_general_dilated(a, w, (1, 1), "VALID",
                                                 dimension_numbers=dn)
    t1 = conv(x, w1) + b1.reshape(1, 1, 1, -1)
    t2 = conv(x[..., :3], w2) + b2.reshape(1, 1, 1, -1)
    t2 = t2[:, : t1.shape[1], : t1.shape[2], :]
    t3 = conv(t1 + t2, w3) + b3.reshape(1, 1, 1, -1)
    t4 = conv(t3, w4) + b4.reshape(1, 1, 1, -1)
    return jnp.transpose(t4, (0, 3, 1, 2))


def _init_params(key):
    """Deterministic synthetic weights, HWIO layout, biases as (Cout,)."""
    ks = jax.random.split(key, 8)

    def conv_init(kw_, kb_, kh, kwid, cin, cout):
        fan_in = kh * kwid * cin
        w = jax.random.normal(kw_, (kh, kwid, cin, cout), jnp.float32)
        w = w * (1.0 / jnp.sqrt(jnp.float32(fan_in)))
        b = 0.1 * jax.random.normal(kb_, (cout,), jnp.float32)
        return w, b

    w1, b1 = conv_init(ks[0], ks[1], 2, 2, 10, 20)
    w2, b2 = conv_init(ks[2], ks[3], 1, 1, 3, 20)
    w3, b3 = conv_init(ks[4], ks[5], 4, 4, 20, 5)
    w4, b4 = conv_init(ks[6], ks[7], 6, 6, 5, 10)
    return (w1, b1, w2, b2, w3, b3, w4, b4)


if __name__ == "__main__":
    key = jax.random.PRNGKey(0)
    k_x, k_p = jax.random.split(key)

    # Small shapes consistent with the module: N=2, Cin=10, spatial 16x16.
    x = jax.random.normal(k_x, (2, 10, 16, 16), jnp.float32)
    params = _init_params(k_p)

    out = jax.block_until_ready(model_tanh_forward(x, params))
    ref = jax.block_until_ready(_ref_forward(x, params))

    assert out.shape == (2, 10, 7, 7), out.shape
    assert jnp.allclose(out, ref, atol=1e-3, rtol=1e-3), (
        float(jnp.max(jnp.abs(out - ref))))

    print("KERNEL_OK")
</pallas_src>

<mosaic_0001>
module attributes {stable_mosaic.version = 11 : i64} {
  func.func @_fused_conv_chain_kernel(%arg0: i32, %arg1: memref<1x16x256xf32, #tpu.memory_space<vmem>>, %arg2: memref<2x24x32xf32, #tpu.memory_space<vmem>>, %arg3: memref<24x1xf32, #tpu.memory_space<vmem>>, %arg4: memref<4x8x96xf32, #tpu.memory_space<vmem>>, %arg5: memref<8x1xf32, #tpu.memory_space<vmem>>, %arg6: memref<6x10x48xf32, #tpu.memory_space<vmem>>, %arg7: memref<10x1xf32, #tpu.memory_space<vmem>>, %arg8: memref<1x10x128xf32, #tpu.memory_space<vmem>>, %arg9: memref<24x239xf32, #tpu.memory_space<vmem>>, %arg10: memref<8x256xf32, #tpu.memory_space<vmem>>) attributes {dimension_semantics = [#tpu.dimension_semantics<parallel>], iteration_bounds = array<i64: 2>, scalar_prefetch = 0 : i64, scratch_operands = 2 : i64, tpu.core_type = #tpu.core_type<tc>, window_params = [{transform_indices = @transform_0, window_bounds = array<i64: 1, 16, 256>}, {pipeline_mode = #tpu.pipeline_mode<synchronous>, transform_indices = @transform_1, window_bounds = array<i64: 2, 24, 32>}, {pipeline_mode = #tpu.pipeline_mode<synchronous>, transform_indices = @transform_2, window_bounds = array<i64: 24, 1>}, {pipeline_mode = #tpu.pipeline_mode<synchronous>, transform_indices = @transform_3, window_bounds = array<i64: 4, 8, 96>}, {pipeline_mode = #tpu.pipeline_mode<synchronous>, transform_indices = @transform_4, window_bounds = array<i64: 8, 1>}, {pipeline_mode = #tpu.pipeline_mode<synchronous>, transform_indices = @transform_5, window_bounds = array<i64: 6, 10, 48>}, {pipeline_mode = #tpu.pipeline_mode<synchronous>, transform_indices = @transform_6, window_bounds = array<i64: 10, 1>}, {transform_indices = @transform_7, window_bounds = array<i64: 1, 10, 128>}]} {
    %cst = arith.constant 0.000000e+00 : f32
    %0 = vector.broadcast %cst : f32 to vector<8x256xf32>
    %c0 = arith.constant 0 : index
    %c0_0 = arith.constant 0 : index
    %1 = vector.load %arg10[%c0, %c0_0] : memref<8x256xf32, #tpu.memory_space<vmem>>, vector<8x256xf32>
    tpu.vector_store %arg10[%c0, %c0_0], %0 {strides = array<i32>} : memref<8x256xf32, #tpu.memory_space<vmem>>, vector<8x256xf32>,
    %cst_1 = arith.constant 0.000000e+00 : f32
    %2 = vector.broadcast %cst_1 : f32 to vector<24x239xf32>
    %c0_2 = arith.constant 0 : index
    %c0_3 = arith.constant 0 : index
    %c0_4 = arith.constant 0 : index
    %3 = vector.load %arg1[%c0_2, %c0_3, %c0_4] : memref<1x16x256xf32, #tpu.memory_space<vmem>>, vector<1x16x239xf32>
    %4 = vector.shape_cast %3 : vector<1x16x239xf32> to vector<16x239xf32>
    %c0_5 = arith.constant 0 : index
    %c0_6 = arith.constant 0 : index
    %c1 = arith.constant 1 : index
    %5 = vector.load %arg1[%c0_5, %c0_6, %c1] : memref<1x16x256xf32, #tpu.memory_space<vmem>>, vector<1x16x239xf32>
    %6 = vector.shape_cast %5 : vector<1x16x239xf32> to vector<16x239xf32>
    %7 = tpu.concatenate %4, %6 in 0 : vector<16x239xf32>, vector<16x239xf32> -> vector<32x239xf32>
    %c0_7 = arith.constant 0 : index
    %c0_8 = arith.constant 0 : index
    %c0_9 = arith.constant 0 : index
    %8 = vector.load %arg2[%c0_7, %c0_8, %c0_9] : memref<2x24x32xf32, #tpu.memory_space<vmem>>, vector<1x24x32xf32>
    %9 = vector.shape_cast %8 : vector<1x24x32xf32> to vector<24x32xf32>
    %cst_10 = arith.constant dense<0.000000e+00> : vector<24x239xf32>
    %10 = tpu.matmul %9, %7, %cst_10 {dimension_numbers = #tpu.dot_dimension_numbers<[1], [0], [0], [1], [0, 0, 1, 1], [], []>} : vector<24x32xf32>, vector<32x239xf32>, vector<24x239xf32> -> vector<24x239xf32>
    %11 = arith.addf %2, %10 : vector<24x239xf32>
    %c0_11 = arith.constant 0 : index
    %c0_12 = arith.constant 0 : index
    %c16 = arith.constant 16 : index
    %12 = vector.load %arg1[%c0_11, %c0_12, %c16] : memref<1x16x256xf32, #tpu.memory_space<vmem>>, vector<1x16x239xf32>
    %13 = vector.shape_cast %12 : vector<1x16x239xf32> to vector<16x239xf32>
    %c0_13 = arith.constant 0 : index
    %c0_14 = arith.constant 0 : index
    %c17 = arith.constant 17 : index
    %14 = vector.load %arg1[%c0_13, %c0_14, %c17] : memref<1x16x256xf32, #tpu.memory_space<vmem>>, vector<1x16x239xf32>
    %15 = vector.shape_cast %14 : vector<1x16x239xf32> to vector<16x239xf32>
    %16 = tpu.concatenate %13, %15 in 0 : vector<16x239xf32>, vector<16x239xf32> -> vector<32x239xf32>
    %c1_15 = arith.constant 1 : index
    %c0_16 = arith.constant 0 : index
    %c0_17 = arith.constant 0 : index
    %17 = vector.load %arg2[%c1_15, %c0_16, %c0_17] : memref<2x24x32xf32, #tpu.memory_space<vmem>>, vector<1x24x32xf32>
    %18 = vector.shape_cast %17 : vector<1x24x32xf32> to vector<24x32xf32>
    %cst_18 = arith.constant dense<0.000000e+00> : vector<24x239xf32>
    %19 = tpu.matmul %18, %16, %cst_18 {dimension_numbers = #tpu.dot_dimension_numbers<[1], [0], [0], [1], [0, 0, 1, 1], [], []>} : vector<24x32xf32>, vector<32x239xf32>, vector<24x239xf32> -> vector<24x239xf32>
    %20 = arith.addf %11, %19 : vector<24x239xf32>
    %c0_19 = arith.constant 0 : index
    %c0_20 = arith.constant 0 : index
    %21 = vector.load %arg3[%c0_19, %c0_20] : memref<24x1xf32, #tpu.memory_space<vmem>>, vector<24x1xf32>
    %22 = vector.broadcast %21 : vector<24x1xf32> to vector<24x239xf32>
    %23 = arith.addf %20, %22 : vector<24x239xf32>
    %c0_21 = arith.constant 0 : index
    %c0_22 = arith.constant 0 : index
    %24 = vector.load %arg9[%c0_21, %c0_22] : memref<24x239xf32, #tpu.memory_space<vmem>>, vector<24x239xf32>
    tpu.vector_store %arg9[%c0_21, %c0_22], %23 {strides = array<i32>} : memref<24x239xf32, #tpu.memory_space<vmem>>, vector<24x239xf32>,
    %cst_23 = arith.constant 0.000000e+00 : f32
    %25 = vector.broadcast %cst_23 : f32 to vector<8x188xf32>
    %c0_24 = arith.constant 0 : index
    %c0_25 = arith.constant 0 : index
    %26 = vector.load %arg9[%c0_24, %c0_25] : memref<24x239xf32, #tpu.memory_space<vmem>>, vector<24x188xf32>
    %c0_26 = arith.constant 0 : index
    %c1_27 = arith.constant 1 : index
    %27 = vector.load %arg9[%c0_26, %c1_27] : memref<24x239xf32, #tpu.memory_space<vmem>>, vector<24x188xf32>
    %c0_28 = arith.constant 0 : index
    %c2 = arith.constant 2 : index
    %28 = vector.load %arg9[%c0_28, %c2] : memref<24x239xf32, #tpu.memory_space<vmem>>, vector<24x188xf32>
    %c0_29 = arith.constant 0 : index
    %c3 = arith.constant 3 : index
    %29 = vector.load %arg9[%c0_29, %c3] : memref<24x239xf32, #tpu.memory_space<vmem>>, vector<24x188xf32>
    %30 = tpu.concatenate %26, %27, %28, %29 in 0 : vector<24x188xf32>, vector<24x188xf32>, vector<24x188xf32>, vector<24x188xf32> -> vector<96x188xf32>
    %c0_30 = arith.constant 0 : index
    %c0_31 = arith.constant 0 : index
    %c0_32 = arith.constant 0 : index
    %31 = vector.load %arg4[%c0_30, %c0_31, %c0_32] : memref<4x8x96xf32, #tpu.memory_space<vmem>>, vector<1x8x96xf32>
    %32 = vector.shape_cast %31 : vector<1x8x96xf32> to vector<8x96xf32>
    %cst_33 = arith.constant dense<0.000000e+00> : vector<8x188xf32>
    %33 = tpu.matmul %32, %30, %cst_33 {dimension_numbers = #tpu.dot_dimension_numbers<[1], [0], [0], [1], [0, 0, 1, 1], [], []>} : vector<8x96xf32>, vector<96x188xf32>, vector<8x188xf32> -> vector<8x188xf32>
    %34 = arith.addf %25, %33 : vector<8x188xf32>
    %c0_34 = arith.constant 0 : index
    %c16_35 = arith.constant 16 : index
    %35 = vector.load %arg9[%c0_34, %c16_35] : memref<24x239xf32, #tpu.memory_space<vmem>>, vector<24x188xf32>
    %c0_36 = arith.constant 0 : index
    %c17_37 = arith.constant 17 : index
    %36 = vector.load %arg9[%c0_36, %c17_37] : memref<24x239xf32, #tpu.memory_space<vmem>>, vector<24x188xf32>
    %c0_38 = arith.constant 0 : index
    %c18 = arith.constant 18 : index
    %37 = vector.load %arg9[%c0_38, %c18] : memref<24x239xf32, #tpu.memory_space<vmem>>, vector<24x188xf32>
    %c0_39 = arith.constant 0 : index
    %c19 = arith.constant 19 : index
    %38 = vector.load %arg9[%c0_39, %c19] : memref<24x239xf32, #tpu.memory_space<vmem>>, vector<24x188xf32>
    %39 = tpu.concatenate %35, %36, %37, %38 in 0 : vector<24x188xf32>, vector<24x188xf32>, vector<24x188xf32>, vector<24x188xf32> -> vector<96x188xf32>
    %c1_40 = arith.constant 1 : index
    %c0_41 = arith.constant 0 : index
    %c0_42 = arith.constant 0 : index
    %40 = vector.load %arg4[%c1_40, %c0_41, %c0_42] : memref<4x8x96xf32, #tpu.memory_space<vmem>>, vector<1x8x96xf32>
    %41 = vector.shape_cast %40 : vector<1x8x96xf32> to vector<8x96xf32>
    %cst_43 = arith.constant dense<0.000000e+00> : vector<8x188xf32>
    %42 = tpu.matmul %41, %39, %cst_43 {dimension_numbers = #tpu.dot_dimension_numbers<[1], [0], [0], [1], [0, 0, 1, 1], [], []>} : vector<8x96xf32>, vector<96x188xf32>, vector<8x188xf32> -> vector<8x188xf32>
    %43 = arith.addf %34, %42 : vector<8x188xf32>
    %c0_44 = arith.constant 0 : index
    %c32 = arith.constant 32 : index
    %44 = vector.load %arg9[%c0_44, %c32] : memref<24x239xf32, #tpu.memory_space<vmem>>, vector<24x188xf32>
    %c0_45 = arith.constant 0 : index
    %c33 = arith.constant 33 : index
    %45 = vector.load %arg9[%c0_45, %c33] : memref<24x239xf32, #tpu.memory_space<vmem>>, vector<24x188xf32>
    %c0_46 = arith.constant 0 : index
    %c34 = arith.constant 34 : index
    %46 = vector.load %arg9[%c0_46, %c34] : memref<24x239xf32, #tpu.memory_space<vmem>>, vector<24x188xf32>
    %c0_47 = arith.constant 0 : index
    %c35 = arith.constant 35 : index
    %47 = vector.load %arg9[%c0_47, %c35] : memref<24x239xf32, #tpu.memory_space<vmem>>, vector<24x188xf32>
    %48 = tpu.concatenate %44, %45, %46, %47 in 0 : vector<24x188xf32>, vector<24x188xf32>, vector<24x188xf32>, vector<24x188xf32> -> vector<96x188xf32>
    %c2_48 = arith.constant 2 : index
    %c0_49 = arith.constant 0 : index
    %c0_50 = arith.constant 0 : index
    %49 = vector.load %arg4[%c2_48, %c0_49, %c0_50] : memref<4x8x96xf32, #tpu.memory_space<vmem>>, vector<1x8x96xf32>
    %50 = vector.shape_cast %49 : vector<1x8x96xf32> to vector<8x96xf32>
    %cst_51 = arith.constant dense<0.000000e+00> : vector<8x188xf32>
    %51 = tpu.matmul %50, %48, %cst_51 {dimension_numbers = #tpu.dot_dimension_numbers<[1], [0], [0], [1], [0, 0, 1, 1], [], []>} : vector<8x96xf32>, vector<96x188xf32>, vector<8x188xf32> -> vector<8x188xf32>
    %52 = arith.addf %43, %51 : vector<8x188xf32>
    %c0_52 = arith.constant 0 : index
    %c48 = arith.constant 48 : index
    %53 = vector.load %arg9[%c0_52, %c48] : memref<24x239xf32, #tpu.memory_space<vmem>>, vector<24x188xf32>
    %c0_53 = arith.constant 0 : index
    %c49 = arith.constant 49 : index
    %54 = vector.load %arg9[%c0_53, %c49] : memref<24x239xf32, #tpu.memory_space<vmem>>, vector<24x188xf32>
    %c0_54 = arith.constant 0 : index
    %c50 = arith.constant 50 : index
    %55 = vector.load %arg9[%c0_54, %c50] : memref<24x239xf32, #tpu.memory_space<vmem>>, vector<24x188xf32>
    %c0_55 = arith.constant 0 : index
    %c51 = arith.constant 51 : index
    %56 = vector.load %arg9[%c0_55, %c51] : memref<24x239xf32, #tpu.memory_space<vmem>>, vector<24x188xf32>
    %57 = tpu.concatenate %53, %54, %55, %56 in 0 : vector<24x188xf32>, vector<24x188xf32>, vector<24x188xf32>, vector<24x188xf32> -> vector<96x188xf32>
    %c3_56 = arith.constant 3 : index
    %c0_57 = arith.constant 0 : index
    %c0_58 = arith.constant 0 : index
    %58 = vector.load %arg4[%c3_56, %c0_57, %c0_58] : memref<4x8x96xf32, #tpu.memory_space<vmem>>, vector<1x8x96xf32>
    %59 = vector.shape_cast %58 : vector<1x8x96xf32> to vector<8x96xf32>
    %cst_59 = arith.constant dense<0.000000e+00> : vector<8x188xf32>
    %60 = tpu.matmul %59, %57, %cst_59 {dimension_numbers = #tpu.dot_dimension_numbers<[1], [0], [0], [1], [0, 0, 1, 1], [], []>} : vector<8x96xf32>, vector<96x188xf32>, vector<8x188xf32> -> vector<8x188xf32>
    %61 = arith.addf %52, %60 : vector<8x188xf32>
    %c0_60 = arith.constant 0 : index
    %c0_61 = arith.constant 0 : index
    %62 = vector.load %arg5[%c0_60, %c0_61] : memref<8x1xf32, #tpu.memory_space<vmem>>, vector<8x1xf32>
    %63 = vector.broadcast %62 : vector<8x1xf32> to vector<8x188xf32>
    %64 = arith.addf %61, %63 : vector<8x188xf32>
    %c0_62 = arith.constant 0 : index
    %c0_63 = arith.constant 0 : index
    %65 = vector.load %arg10[%c0_62, %c0_63] : memref<8x256xf32, #tpu.memory_space<vmem>>, vector<8x188xf32>
    tpu.vector_store %arg10[%c0_62, %c0_63], %64 {strides = array<i32>} : memref<8x256xf32, #tpu.memory_space<vmem>>, vector<8x188xf32>,
    %cst_64 = arith.constant 0.000000e+00 : f32
    %66 = vector.broadcast %cst_64 : f32 to vector<10x128xf32>
    %c0_65 = arith.constant 0 : index
    %c0_66 = arith.constant 0 : index
    %67 = vector.load %arg10[%c0_65, %c0_66] : memref<8x256xf32, #tpu.memory_space<vmem>>, vector<8x128xf32>
    %c0_67 = arith.constant 0 : index
    %c1_68 = arith.constant 1 : index
    %68 = vector.load %arg10[%c0_67, %c1_68] : memref<8x256xf32, #tpu.memory_space<vmem>>, vector<8x128xf32>
    %c0_69 = arith.constant 0 : index
    %c2_70 = arith.constant 2 : index
    %69 = vector.load %arg10[%c0_69, %c2_70] : memref<8x256xf32, #tpu.memory_space<vmem>>, vector<8x128xf32>
    %c0_71 = arith.constant 0 : index
    %c3_72 = arith.constant 3 : index
    %70 = vector.load %arg10[%c0_71, %c3_72] : memref<8x256xf32, #tpu.memory_space<vmem>>, vector<8x128xf32>
    %c0_73 = arith.constant 0 : index
    %c4 = arith.constant 4 : index
    %71 = vector.load %arg10[%c0_73, %c4] : memref<8x256xf32, #tpu.memory_space<vmem>>, vector<8x128xf32>
    %c0_74 = arith.constant 0 : index
    %c5 = arith.constant 5 : index
    %72 = vector.load %arg10[%c0_74, %c5] : memref<8x256xf32, #tpu.memory_space<vmem>>, vector<8x128xf32>
    %73 = tpu.concatenate %67, %68, %69, %70, %71, %72 in 0 : vector<8x128xf32>, vector<8x128xf32>, vector<8x128xf32>, vector<8x128xf32>, vector<8x128xf32>, vector<8x128xf32> -> vector<48x128xf32>
    %c0_75 = arith.constant 0 : index
    %c0_76 = arith.constant 0 : index
    %c0_77 = arith.constant 0 : index
    %74 = vector.load %arg6[%c0_75, %c0_76, %c0_77] : memref<6x10x48xf32, #tpu.memory_space<vmem>>, vector<1x10x48xf32>
    %75 = vector.shape_cast %74 : vector<1x10x48xf32> to vector<10x48xf32>
    %cst_78 = arith.constant dense<0.000000e+00> : vector<10x128xf32>
    %76 = tpu.matmul %75, %73, %cst_78 {dimension_numbers = #tpu.dot_dimension_numbers<[1], [0], [0], [1], [0, 0, 1, 1], [], []>} : vector<10x48xf32>, vector<48x128xf32>, vector<10x128xf32> -> vector<10x128xf32>
    %77 = arith.addf %66, %76 : vector<10x128xf32>
    %c0_79 = arith.constant 0 : index
    %c16_80 = arith.constant 16 : index
    %78 = vector.load %arg10[%c0_79, %c16_80] : memref<8x256xf32, #tpu.memory_space<vmem>>, vector<8x128xf32>
    %c0_81 = arith.constant 0 : index
    %c17_82 = arith.constant 17 : index
    %79 = vector.load %arg10[%c0_81, %c17_82] : memref<8x256xf32, #tpu.memory_space<vmem>>, vector<8x128xf32>
    %c0_83 = arith.constant 0 : index
    %c18_84 = arith.constant 18 : index
    %80 = vector.load %arg10[%c0_83, %c18_84] : memref<8x256xf32, #tpu.memory_space<vmem>>, vector<8x128xf32>
    %c0_85 = arith.constant 0 : index
    %c19_86 = arith.constant 19 : index
    %81 = vector.load %arg10[%c0_85, %c19_86] : memref<8x256xf32, #tpu.memory_space<vmem>>, vector<8x128xf32>
    %c0_87 = arith.constant 0 : index
    %c20 = arith.constant 20 : index
    %82 = vector.load %arg10[%c0_87, %c20] : memref<8x256xf32, #tpu.memory_space<vmem>>, vector<8x128xf32>
    %c0_88 = arith.constant 0 : index
    %c21 = arith.constant 21 : index
    %83 = vector.load %arg10[%c0_88, %c21] : memref<8x256xf32, #tpu.memory_space<vmem>>, vector<8x128xf32>
    %84 = tpu.concatenate %78, %79, %80, %81, %82, %83 in 0 : vector<8x128xf32>, vector<8x128xf32>, vector<8x128xf32>, vector<8x128xf32>, vector<8x128xf32>, vector<8x128xf32> -> vector<48x128xf32>
    %c1_89 = arith.constant 1 : index
    %c0_90 = arith.constant 0 : index
    %c0_91 = arith.constant 0 : index
    %85 = vector.load %arg6[%c1_89, %c0_90, %c0_91] : memref<6x10x48xf32, #tpu.memory_space<vmem>>, vector<1x10x48xf32>
    %86 = vector.shape_cast %85 : vector<1x10x48xf32> to vector<10x48xf32>
    %cst_92 = arith.constant dense<0.000000e+00> : vector<10x128xf32>
    %87 = tpu.matmul %86, %84, %cst_92 {dimension_numbers = #tpu.dot_dimension_numbers<[1], [0], [0], [1], [0, 0, 1, 1], [], []>} : vector<10x48xf32>, vector<48x128xf32>, vector<10x128xf32> -> vector<10x128xf32>
    %88 = arith.addf %77, %87 : vector<10x128xf32>
    %c0_93 = arith.constant 0 : index
    %c32_94 = arith.constant 32 : index
    %89 = vector.load %arg10[%c0_93, %c32_94] : memref<8x256xf32, #tpu.memory_space<vmem>>, vector<8x128xf32>
    %c0_95 = arith.constant 0 : index
    %c33_96 = arith.constant 33 : index
    %90 = vector.load %arg10[%c0_95, %c33_96] : memref<8x256xf32, #tpu.memory_space<vmem>>, vector<8x128xf32>
    %c0_97 = arith.constant 0 : index
    %c34_98 = arith.constant 34 : index
    %91 = vector.load %arg10[%c0_97, %c34_98] : memref<8x256xf32, #tpu.memory_space<vmem>>, vector<8x128xf32>
    %c0_99 = arith.constant 0 : index
    %c35_100 = arith.constant 35 : index
    %92 = vector.load %arg10[%c0_99, %c35_100] : memref<8x256xf32, #tpu.memory_space<vmem>>, vector<8x128xf32>
    %c0_101 = arith.constant 0 : index
    %c36 = arith.constant 36 : index
    %93 = vector.load %arg10[%c0_101, %c36] : memref<8x256xf32, #tpu.memory_space<vmem>>, vector<8x128xf32>
    %c0_102 = arith.constant 0 : index
    %c37 = arith.constant 37 : index
    %94 = vector.load %arg10[%c0_102, %c37] : memref<8x256xf32, #tpu.memory_space<vmem>>, vector<8x128xf32>
    %95 = tpu.concatenate %89, %90, %91, %92, %93, %94 in 0 : vector<8x128xf32>, vector<8x128xf32>, vector<8x128xf32>, vector<8x128xf32>, vector<8x128xf32>, vector<8x128xf32> -> vector<48x128xf32>
    %c2_103 = arith.constant 2 : index
    %c0_104 = arith.constant 0 : index
    %c0_105 = arith.constant 0 : index
    %96 = vector.load %arg6[%c2_103, %c0_104, %c0_105] : memref<6x10x48xf32, #tpu.memory_space<vmem>>, vector<1x10x48xf32>
    %97 = vector.shape_cast %96 : vector<1x10x48xf32> to vector<10x48xf32>
    %cst_106 = arith.constant dense<0.000000e+00> : vector<10x128xf32>
    %98 = tpu.matmul %97, %95, %cst_106 {dimension_numbers = #tpu.dot_dimension_numbers<[1], [0], [0], [1], [0, 0, 1, 1], [], []>} : vector<10x48xf32>, vector<48x128xf32>, vector<10x128xf32> -> vector<10x128xf32>
    %99 = arith.addf %88, %98 : vector<10x128xf32>
    %c0_107 = arith.constant 0 : index
    %c48_108 = arith.constant 48 : index
    %100 = vector.load %arg10[%c0_107, %c48_108] : memref<8x256xf32, #tpu.memory_space<vmem>>, vector<8x128xf32>
    %c0_109 = arith.constant 0 : index
    %c49_110 = arith.constant 49 : index
    %101 = vector.load %arg10[%c0_109, %c49_110] : memref<8x256xf32, #tpu.memory_space<vmem>>, vector<8x128xf32>
    %c0_111 = arith.constant 0 : index
    %c50_112 = arith.constant 50 : index
    %102 = vector.load %arg10[%c0_111, %c50_112] : memref<8x256xf32, #tpu.memory_space<vmem>>, vector<8x128xf32>
    %c0_113 = arith.constant 0 : index
    %c51_114 = arith.constant 51 : index
    %103 = vector.load %arg10[%c0_113, %c51_114] : memref<8x256xf32, #tpu.memory_space<vmem>>, vector<8x128xf32>
    %c0_115 = arith.constant 0 : index
    %c52 = arith.constant 52 : index
    %104 = vector.load %arg10[%c0_115, %c52] : memref<8x256xf32, #tpu.memory_space<vmem>>, vector<8x128xf32>
    %c0_116 = arith.constant 0 : index
    %c53 = arith.constant 53 : index
    %105 = vector.load %arg10[%c0_116, %c53] : memref<8x256xf32, #tpu.memory_space<vmem>>, vector<8x128xf32>
    %106 = tpu.concatenate %100, %101, %102, %103, %104, %105 in 0 : vector<8x128xf32>, vector<8x128xf32>, vector<8x128xf32>, vector<8x128xf32>, vector<8x128xf32>, vector<8x128xf32> -> vector<48x128xf32>
    %c3_117 = arith.constant 3 : index
    %c0_118 = arith.constant 0 : index
    %c0_119 = arith.constant 0 : index
    %107 = vector.load %arg6[%c3_117, %c0_118, %c0_119] : memref<6x10x48xf32, #tpu.memory_space<vmem>>, vector<1x10x48xf32>
    %108 = vector.shape_cast %107 : vector<1x10x48xf32> to vector<10x48xf32>
    %cst_120 = arith.constant dense<0.000000e+00> : vector<10x128xf32>
    %109 = tpu.matmul %108, %106, %cst_120 {dimension_numbers = #tpu.dot_dimension_numbers<[1], [0], [0], [1], [0, 0, 1, 1], [], []>} : vector<10x48xf32>, vector<48x128xf32>, vector<10x128xf32> -> vector<10x128xf32>
    %110 = arith.addf %99, %109 : vector<10x128xf32>
    %c0_121 = arith.constant 0 : index
    %c64 = arith.constant 64 : index
    %111 = vector.load %arg10[%c0_121, %c64] : memref<8x256xf32, #tpu.memory_space<vmem>>, vector<8x128xf32>
    %c0_122 = arith.constant 0 : index
    %c65 = arith.constant 65 : index
    %112 = vector.load %arg10[%c0_122, %c65] : memref<8x256xf32, #tpu.memory_space<vmem>>, vector<8x128xf32>
    %c0_123 = arith.constant 0 : index
    %c66 = arith.constant 66 : index
    %113 = vector.load %arg10[%c0_123, %c66] : memref<8x256xf32, #tpu.memory_space<vmem>>, vector<8x128xf32>
    %c0_124 = arith.constant 0 : index
    %c67 = arith.constant 67 : index
    %114 = vector.load %arg10[%c0_124, %c67] : memref<8x256xf32, #tpu.memory_space<vmem>>, vector<8x128xf32>
    %c0_125 = arith.constant 0 : index
    %c68 = arith.constant 68 : index
    %115 = vector.load %arg10[%c0_125, %c68] : memref<8x256xf32, #tpu.memory_space<vmem>>, vector<8x128xf32>
    %c0_126 = arith.constant 0 : index
    %c69 = arith.constant 69 : index
    %116 = vector.load %arg10[%c0_126, %c69] : memref<8x256xf32, #tpu.memory_space<vmem>>, vector<8x128xf32>
    %117 = tpu.concatenate %111, %112, %113, %114, %115, %116 in 0 : vector<8x128xf32>, vector<8x128xf32>, vector<8x128xf32>, vector<8x128xf32>, vector<8x128xf32>, vector<8x128xf32> -> vector<48x128xf32>
    %c4_127 = arith.constant 4 : index
    %c0_128 = arith.constant 0 : index
    %c0_129 = arith.constant 0 : index
    %118 = vector.load %arg6[%c4_127, %c0_128, %c0_129] : memref<6x10x48xf32, #tpu.memory_space<vmem>>, vector<1x10x48xf32>
    %119 = vector.shape_cast %118 : vector<1x10x48xf32> to vector<10x48xf32>
    %cst_130 = arith.constant dense<0.000000e+00> : vector<10x128xf32>
    %120 = tpu.matmul %119, %117, %cst_130 {dimension_numbers = #tpu.dot_dimension_numbers<[1], [0], [0], [1], [0, 0, 1, 1], [], []>} : vector<10x48xf32>, vector<48x128xf32>, vector<10x128xf32> -> vector<10x128xf32>
    %121 = arith.addf %110, %120 : vector<10x128xf32>
    %c0_131 = arith.constant 0 : index
    %c80 = arith.constant 80 : index
    %122 = vector.load %arg10[%c0_131, %c80] : memref<8x256xf32, #tpu.memory_space<vmem>>, vector<8x128xf32>
    %c0_132 = arith.constant 0 : index
    %c81 = arith.constant 81 : index
    %123 = vector.load %arg10[%c0_132, %c81] : memref<8x256xf32, #tpu.memory_space<vmem>>, vector<8x128xf32>
    %c0_133 = arith.constant 0 : index
    %c82 = arith.constant 82 : index
    %124 = vector.load %arg10[%c0_133, %c82] : memref<8x256xf32, #tpu.memory_space<vmem>>, vector<8x128xf32>
    %c0_134 = arith.constant 0 : index
    %c83 = arith.constant 83 : index
    %125 = vector.load %arg10[%c0_134, %c83] : memref<8x256xf32, #tpu.memory_space<vmem>>, vector<8x128xf32>
    %c0_135 = arith.constant 0 : index
    %c84 = arith.constant 84 : index
    %126 = vector.load %arg10[%c0_135, %c84] : memref<8x256xf32, #tpu.memory_space<vmem>>, vector<8x128xf32>
    %c0_136 = arith.constant 0 : index
    %c85 = arith.constant 85 : index
    %127 = vector.load %arg10[%c0_136, %c85] : memref<8x256xf32, #tpu.memory_space<vmem>>, vector<8x128xf32>
    %128 = tpu.concatenate %122, %123, %124, %125, %126, %127 in 0 : vector<8x128xf32>, vector<8x128xf32>, vector<8x128xf32>, vector<8x128xf32>, vector<8x128xf32>, vector<8x128xf32> -> vector<48x128xf32>
    %c5_137 = arith.constant 5 : index
    %c0_138 = arith.constant 0 : index
    %c0_139 = arith.constant 0 : index
    %129 = vector.load %arg6[%c5_137, %c0_138, %c0_139] : memref<6x10x48xf32, #tpu.memory_space<vmem>>, vector<1x10x48xf32>
    %130 = vector.shape_cast %129 : vector<1x10x48xf32> to vector<10x48xf32>
    %cst_140 = arith.constant dense<0.000000e+00> : vector<10x128xf32>
    %131 = tpu.matmul %130, %128, %cst_140 {dimension_numbers = #tpu.dot_dimension_numbers<[1], [0], [0], [1], [0, 0, 1, 1], [], []>} : vector<10x48xf32>, vector<48x128xf32>, vector<10x128xf32> -> vector<10x128xf32>
    %132 = arith.addf %121, %131 : vector<10x128xf32>
    %c0_141 = arith.constant 0 : index
    %c0_142 = arith.constant 0 : index
    %133 = vector.load %arg7[%c0_141, %c0_142] : memref<10x1xf32, #tpu.memory_space<vmem>>, vector<10x1xf32>
    %134 = vector.broadcast %133 : vector<10x1xf32> to vector<10x128xf32>
    %135 = arith.addf %132, %134 : vector<10x128xf32>
    %c0_143 = arith.constant 0 : index
    %c0_144 = arith.constant 0 : index
    %c0_145 = arith.constant 0 : index
    %136 = vector.load %arg8[%c0_143, %c0_144, %c0_145] : memref<1x10x128xf32, #tpu.memory_space<vmem>>, vector<1x10x128xf32>
    %137 = vector.shape_cast %136 : vector<1x10x128xf32> to vector<10x128xf32>
    %138 = vector.shape_cast %135 : vector<10x128xf32> to vector<1x10x128xf32>
    tpu.vector_store %arg8[%c0_143, %c0_144, %c0_145], %138 {strides = array<i32>} : memref<1x10x128xf32, #tpu.memory_space<vmem>>, vector<1x10x128xf32>,
    return
  }
  func.func @transform_0(%arg0: i32) -> (i32, i32, i32) {
    %c0_i32 = arith.constant 0 : i32
    %c0_i32_0 = arith.constant 0 : i32
    %c0_i32_1 = arith.constant 0 : i32
    return %arg0, %c0_i32, %c0_i32_0 : i32, i32, i32
  }
  func.func @transform_1(%arg0: i32) -> (i32, i32, i32) {
    %c0_i32 = arith.constant 0 : i32
    %c0_i32_0 = arith.constant 0 : i32
    %c0_i32_1 = arith.constant 0 : i32
    %c0_i32_2 = arith.constant 0 : i32
    return %c0_i32, %c0_i32_0, %c0_i32_1 : i32, i32, i32
  }
  func.func @transform_2(%arg0: i32) -> (i32, i32) {
    %c0_i32 = arith.constant 0 : i32
    %c0_i32_0 = arith.constant 0 : i32
    %c0_i32_1 = arith.constant 0 : i32
    return %c0_i32, %c0_i32_0 : i32, i32
  }
  func.func @transform_3(%arg0: i32) -> (i32, i32, i32) {
    %c0_i32 = arith.constant 0 : i32
    %c0_i32_0 = arith.constant 0 : i32
    %c0_i32_1 = arith.constant 0 : i32
    %c0_i32_2 = arith.constant 0 : i32
    return %c0_i32, %c0_i32_0, %c0_i32_1 : i32, i32, i32
  }
  func.func @transform_4(%arg0: i32) -> (i32, i32) {
    %c0_i32 = arith.constant 0 : i32
    %c0_i32_0 = arith.constant 0 : i32
    %c0_i32_1 = arith.constant 0 : i32
    return %c0_i32, %c0_i32_0 : i32, i32
  }
  func.func @transform_5(%arg0: i32) -> (i32, i32, i32) {
    %c0_i32 = arith.constant 0 : i32
    %c0_i32_0 = arith.constant 0 : i32
    %c0_i32_1 = arith.constant 0 : i32
    %c0_i32_2 = arith.constant 0 : i32
    return %c0_i32, %c0_i32_0, %c0_i32_1 : i32, i32, i32
  }
  func.func @transform_6(%arg0: i32) -> (i32, i32) {
    %c0_i32 = arith.constant 0 : i32
    %c0_i32_0 = arith.constant 0 : i32
    %c0_i32_1 = arith.constant 0 : i32
    return %c0_i32, %c0_i32_0 : i32, i32
  }
  func.func @transform_7(%arg0: i32) -> (i32, i32, i32) {
    %c0_i32 = arith.constant 0 : i32
    %c0_i32_0 = arith.constant 0 : i32
    %c0_i32_1 = arith.constant 0 : i32
    return %arg0, %c0_i32, %c0_i32_0 : i32, i32, i32
  }
}

</mosaic_0001>

<bundles_post_ra>
// kernel: model_tanh_forward.1
= control target key start
LH: loop header
LB: loop body
LE: loop exit
PB: predicated region body
PF: predicated region fallthrough
CT: control target
= control target key end

     0   :  { %s2913_s24 = smov 0   ;;  %s3436_s0 = inlined_call_operand.vmem [shape: f32[2,16,256], index: 0, kind: input, shape index: {}]   ;;  %s3437_s1 = inlined_call_operand.vmem [shape: f32[2,24,32], index: 1, kind: input, shape index: {}]   ;;  %s3438_s2 = inlined_call_operand.vmem [shape: f32[24,1], index: 2, kind: input, shape index: {}]   ;;  %s3439_s3 = inlined_call_operand.vmem [shape: f32[4,8,96], index: 3, kind: input, shape index: {}]   ;;  %s3440_s4 = inlined_call_operand.vmem [shape: f32[8,1], index: 4, kind: input, shape index: {}]   ;;  %s3441_s5 = inlined_call_operand.vmem [shape: f32[6,10,48], index: 5, kind: input, shape index: {}]   ;;  %s3442_s6 = inlined_call_operand.vmem [shape: f32[10,1], index: 6, kind: input, shape index: {}]   ;;  %s3443_s7 = inlined_call_operand.vmem [shape: f32[2,10,128], index: 7, kind: output, shape index: {}]  }
   0x1 LB: > { %s2006_s25 = sadd.s32 4294967295, %s2859_s24   ;;  %p2010_p0 = scmp.ge.s32.totalorder %s2859_s24, 1  ;;  %s2859_s24 = sphi %s2913_s24, %s17_s24  }
   0x2   : > { %p237_p1 = scmp.lt.s32.totalorder %s2859_s24, 3 }
   0x4   : > { %p238_p2 = pnand %p2010_p0, %p237_p1 }
   0x5   : > { %p269_p3 = scmp.lt.s32.totalorder (!%p238_p2), %s2006_s25, 1  ;;  %s2861_s30 = smov (!%p238_p2), 127   ;;  %vm297_vm0 = vcmask (!%p238_p2), 1039360   ;;  %vm327_vm1 = vcmask (!%p238_p2), 916480   ;;  %v2863_v14 = vmov (!%p238_p2), 0.0   ;;  %v525_v30 = vld [vmem:[%s3438_s2] sm:$0xff] (!%p238_p2) }
   0x6   : > { %241 = sbr.rel (%p238_p2) target bundleno = 1591 (0x637), region = 48  ;;  %s2862_s8 = smov (!%p238_p2), 112   ;;  %414 = vmatprep.mubr.f32.mxu0 (!%p238_p2), %v2863_v14  ;;  %280 = vst [vmem:[#allocation3 + $0x8] sm:$0xff] (!%p238_p2), %v2863_v14  ;;  %788 = vmatprep.mubr.f32.mxu1 (!%p238_p2), %v2863_v14  ;;  %v526_v31 = vld [vmem:[%s3438_s2 + $0x8] sm:$0xff] (!%p238_p2)  ;;  %v2864_v32 = vmov (!%p238_p2), 0   ;;  %v527_v33 = vld [vmem:[%s3438_s2 + $0x10] sm:$0xff] (!%p238_p2) }
   0x7   : > { %2451 = vset.pattern.permute.xlu0 (!%p238_p2), %v2864_v32  ;;  %2452 = vset.pattern.permute.xlu1 (!%p238_p2), %v2864_v32  ;;  %v2015_v45 = vld [vmem:[%s3437_s1 + $0x18] sm:$0xff] (!%p238_p2)  ;;  %vm340_vm2 = vcmask (!%p238_p2), 261120   ;;  %v2016_v46 = vld [vmem:[%s3437_s1 + $0x20] sm:$0xff] (!%p238_p2)  ;;  %v2017_v47 = vld [vmem:[%s3437_s1 + $0x28] sm:$0xff] (!%p238_p2)  ;;  %vm550_vm3 = vcmask (!%p238_p2), 908288   ;;  %s2866_s9 = smov (!%p238_p2), 125  }
   0x8   : > { %v304_v48 = vld [vmem:[%s3437_s1] sm:$0xff] (!%p238_p2)  ;;  %v305_v49 = vld [vmem:[%s3437_s1 + $0x8] sm:$0xff] (!%p238_p2)  ;;  %v306_v50 = vld [vmem:[%s3437_s1 + $0x10] sm:$0xff] (!%p238_p2)  ;;  %vm601_vm4 = vcmask (!%p238_p2), 1031168   ;;  %vm623_vm5 = vcmask (!%p238_p2), 1022976   ;;  %s2867_s10 = smov (!%p238_p2), 96  }
   0x9   : > { %s2868_s11 = smov (!%p238_p2), 80   ;;  %vm720_vm6 = vcmask (!%p238_p2), 785408   ;;  %vm1081_vm7 = vcmask (!%p238_p2), 654336   ;;  %vm1203_vm8 = vcmask (!%p238_p2), 490496   ;;  %s2869_s22 = smov (!%p238_p2), 124   ;;  %vm1232_vm9 = vcmask (!%p238_p2), 1014784  }
   0xa   : > { %s2870_s23 = smov (!%p238_p2), 123   ;;  %vm1239_vm10 = vcmask (!%p238_p2), 1006592   ;;  %vm1283_vm11 = vcmask (!%p238_p2), 392192   ;;  %s2872_s27 = smov (!%p238_p2), 48   ;;  %vm1717_vm12 = vcmask (!%p238_p2), 523264  }
   0xd   : > { %s3445_s25 = smov (!%p269_p3, %s2006_s25), 1 }
   0xe   : > { %s2055_s26 = sshll.u32 %s3445_s25, 5  ;;  %s2056_s12 = sshll.u32 %s3445_s25, 4 }
   0xf   : > { %s273_s29 = scalar_lea.vmem %s3436_s0, %s2055_s26  ;;  %s278_s15 = scalar_lea.vmem %s3443_s7, %s2056_s12 }
  0x10   : > { %v2927_v0 = vld [vmem:[%s273_s29] sm:$0xff]  ;;  %v2929_v1 = vld [vmem:[%s273_s29 + $0x8] sm:$0xff]  ;;  %v2931_v2 = vld [vmem:[%s273_s29 + $0x10] sm:$0xff] }
  0x11   : > { %v2421_v3 = vpack.i.bf16 %v2929_v1, %v2927_v0  ;;  %v2205_v4 = vpack.c.bf16 %v2931_v2, %v2927_v0  ;;  %v2937_v5 = vld [vmem:[%s273_s29 + $0x18] sm:$0xff]  ;;  %s2865_s29 = smov 126  }
  0x12   : > { %v2426_v6 = vpack.i.bf16 %v2937_v5, %v2931_v2  ;;  %v2203_v43 = vpack.c.bf16 %v2937_v5, %v2929_v1 }
  0x13   : > { %2422 = vrot.lane.b32.xlu0 %v2421_v3, %s2861_s30  ;;  %2432 = vrot.lane.b32.xlu1 %v2421_v3, %s2862_s8 }
  0x17   : > { %2427 = vrot.lane.b32.xlu0 %v2426_v6, %s2861_s30  ;;  %2437 = vrot.lane.b32.xlu1 %v2426_v6, %s2862_s8 }
  0x85   : > { %v2423_v7 = vpop.permute.xlu0 %2422  ;;  %v2433_v8 = vpop.permute.xlu1 %2432 }
  0x86   : > { %v2425_v9 = vunpack.i.h.bf16 %v2423_v7  ;;  %v2424_v10 = vunpack.i.l.bf16 %v2423_v7  ;;  %v2435_v11 = vunpack.i.h.bf16 %v2433_v8  ;;  %v2434_v12 = vunpack.i.l.bf16 %v2433_v8 }
  0x88   : > { %v298_v13 = vsel %vm297_vm0, %v2424_v10, %v2425_v9  ;;  %v328_v18 = vsel %vm327_vm1, %v2434_v12, %v2435_v11 }
  0x89   : > { %v2428_v15 = vpop.permute.xlu0 %2427  ;;  %v2441_v16 = vpack.i.bf16 %v2425_v9, %v298_v13  ;;  %v2438_v17 = vpop.permute.xlu1 %2437 }
  0x8a   : > { %v2430_v19 = vunpack.i.h.bf16 %v2428_v15  ;;  %v2429_v20 = vunpack.i.l.bf16 %v2428_v15  ;;  %v2440_v21 = vunpack.i.h.bf16 %v2438_v17  ;;  %v2439_v22 = vunpack.i.l.bf16 %v2438_v17 }
  0x8b   : > { %2442 = vrot.lane.b32.xlu0 %v2441_v16, %s2862_s8 }
  0x8c   : > { %v299_v23 = vsel %vm297_vm0, %v2429_v20, %v2430_v19  ;;  %v2195_v24 = vpack.c.bf16 %v2440_v21, %v2435_v11  ;;  %v329_v25 = vsel %vm327_vm1, %v2439_v22, %v2440_v21  ;;  %v2207_v26 = vpack.c.bf16 %v2430_v19, %v2425_v9 }
  0x8d   : > { %v2446_v27 = vpack.i.bf16 %v2430_v19, %v299_v23  ;;  %v2209_v28 = vpack.c.bf16 %v299_v23, %v298_v13  ;;  %v2197_v29 = vpack.c.bf16 %v329_v25, %v328_v18 }
  0x8e   : > { %2196 = vmatprep.subr.bf16.mxu0 %v2195_v24 }
  0x8f   : > { %2447 = vrot.lane.b32.xlu1 %v2446_v27, %s2862_s8  ;;  %2198 = vmatpush1.bf16.msra.mxu0 %v2197_v29 }
  0x90   : > { %530 = vperm.xlu0 %2451, %v525_v30  }
  0x93   : > { %535 = vperm.xlu1 %2452, %v526_v31  }
  0x97   : > { %540 = vperm.xlu1 %2452, %v527_v33  }
  0xfd   : > { %v2443_v34 = vpop.permute.xlu0 %2442 }
  0xfe   : > { %v2445_v35 = vunpack.i.h.bf16 %v2443_v34  ;;  %v2444_v36 = vunpack.i.l.bf16 %v2443_v34 }
 0x100   : > { %v330_v41 = vsel %vm327_vm1, %v2444_v36, %v2445_v35 }
 0x101   : > { %v2448_v37 = vpop.permute.xlu1 %2447 }
 0x102   : > { %v2450_v38 = vunpack.i.h.bf16 %v2448_v37  ;;  %v2449_v39 = vunpack.i.l.bf16 %v2448_v37 }
 0x104   : > { %v2199_v40 = vpack.c.bf16 %v2450_v38, %v2445_v35  ;;  %v331_v42 = vsel %vm327_vm1, %v2449_v39, %v2450_v38 }
 0x105   : > { %v2201_v44 = vpack.c.bf16 %v331_v42, %v330_v41 }
 0x106   : > { %2200 = vmatprep.subr.bf16.mxu0 %v2199_v40 }
 0x107   : > { %2202 = vmatpush1.bf16.msra.mxu0 %v2201_v44 }
 0x108   : > { %2204 = vmatprep.subr.bf16.mxu0 %v2203_v43 }
 0x10a   : > { %2018 = vmatmul.mubr.msk.f32.vlgmr.msra.gmra.mrb[0].mxu0 %vm340_vm2, %v2015_v45 }
 0x10b   : > { %2206 = vmatpush1.bf16.msra.mxu0 %v2205_v4  ;;  %420 = vmatprep.mubr.f32.mxu0 %v2863_v14 }
 0x10c   : > { %2208 = vmatprep.subr.bf16.mxu0 %v2207_v26 }
 0x10e   : > { %2019 = vmatmul.mubr.msk.f32.gmra.mrb[2].mxu0 %vm340_vm2, %v2016_v46 }
 0x10f   : > { %2210 = vmatpush1.bf16.msra.mxu0 %v2209_v28  ;;  %426 = vmatprep.mubr.f32.mxu0 %v2863_v14  ;;  %v531_v51 = vpop.permute.xlu0 %530 }
 0x112   : > { %2020 = vmatmul.mubr.msk.f32.gmra.mrb[4].mxu0 %vm340_vm2, %v2017_v47  ;;  %v536_v56 = vpop.permute.xlu1 %535 }
 0x113   : > { %506 = vmatprep.mubr.f32.mxu0 %v2863_v14 }
 0x116   : > { %2021 = vmatmul.mubr.msk.f32.vlgmr.msra.gmra.mrb[0].mxu0 %vm340_vm2, %v304_v48  ;;  %v541_v62 = vpop.permute.xlu1 %540 }
 0x117   : > { %512 = vmatprep.mubr.f32.mxu0 %v2863_v14 }
 0x11a   : > { %2022 = vmatmul.mubr.msk.f32.gmra.mrb[2].mxu0 %vm340_vm2, %v305_v49 }
 0x11b   : > { %518 = vmatprep.mubr.f32.mxu0 %v2863_v14 }
 0x11e   : > { %2023 = vmatmul.mubr.msk.f32.gmra.mrb[4].mxu0 %vm340_vm2, %v306_v50 }
 0x1e9   : > { %v508_v52 = vpop.f32.mrb[0].mxu0 }
 0x1ea   : > { %v2999_v53 = vadd.f32 %v531_v51, %v508_v52  ;;  %v510_v54 = vpop.f32.mrb[1].mxu0 }
 0x1eb   : > { %v544_v55 = vadd.f32 %v531_v51, %v510_v54 }
 0x1ed   : > { %551 = vst.msk [vmem:[#allocation2 + $0x8] sm:$0xff] %vm550_vm3, %v544_v55  ;;  %v514_v57 = vpop.f32.mrb[2].mxu0 }
 0x1ee   : > { %v3002_v58 = vadd.f32 %v536_v56, %v514_v57  ;;  %v516_v59 = vpop.f32.mrb[3].mxu0 }
 0x1ef   : > { %v546_v60 = vadd.f32 %v536_v56, %v516_v59 }
 0x1f0   : > { %v2237_v61 = vpack.c.bf16 %v3002_v58, %v2999_v53 }
 0x1f1   : > { %553 = vst.msk [vmem:[#allocation2 + $0x18] sm:$0xff] %vm550_vm3, %v546_v60  ;;  %v520_v63 = vpop.f32.mrb[4].mxu0 }
 0x1f2   : > { %v3007_v0 = vadd.f32 %v541_v62, %v520_v63  ;;  %v522_v1 = vpop.f32.mrb[5].mxu0 }
 0x1f3   : > { %v548_v2 = vadd.f32 %v541_v62, %v522_v1 }
 0x1f4   : > { %v3009_v3 = vld [vmem:[#allocation2 + $0x8] sm:$0xff] }
 0x1f5   : > { %555 = vst.msk [vmem:[#allocation2 + $0x28] sm:$0xff] %vm550_vm3, %v548_v2  ;;  %v3014_v4 = vpack.i.bf16 %v3009_v3, %v2999_v53 }
 0x1f7   : > { %2454 = vrot.lane.b32.xlu0 %v3014_v4, %s2861_s30 }
 0x1f8   : > { %v3018_v5 = vld [vmem:[#allocation2 + $0x18] sm:$0xff] }
 0x1f9   : > { %v3022_v6 = vpack.i.bf16 %v3018_v5, %v3002_v58  ;;  %v2235_v7 = vpack.c.bf16 %v3018_v5, %v3009_v3 }
 0x1fb   : > { %2459 = vrot.lane.b32.xlu1 %v3022_v6, %s2861_s30 }
 0x1fc   : > { %v3028_v8 = vld [vmem:[#allocation2 + $0x28] sm:$0xff] }
 0x1fd   : > { %v3032_v9 = vpack.i.bf16 %v3028_v8, %v3007_v0 }
 0x1ff   : > { %2464 = vrot.lane.b32.xlu1 %v3014_v4, %s2865_s29  ;;  %2469 = vrot.lane.b32.xlu0 %v3032_v9, %s2861_s30 }
 0x203   : > { %2484 = vrot.lane.b32.xlu1 %v3032_v9, %s2865_s29  ;;  %2474 = vrot.lane.b32.xlu0 %v3022_v6, %s2865_s29 }
 0x207   : > { %2489 = vrot.lane.b32.xlu1 %v3022_v6, %s2866_s9  ;;  %2479 = vrot.lane.b32.xlu0 %v3014_v4, %s2866_s9 }
 0x20b   : > { %2499 = vrot.lane.b32.xlu1 %v3014_v4, %s2862_s8  ;;  %2494 = vrot.lane.b32.xlu0 %v3032_v9, %s2866_s9 }
 0x20f   : > { %2509 = vrot.lane.b32.xlu1 %v3032_v9, %s2862_s8  ;;  %2504 = vrot.lane.b32.xlu0 %v3022_v6, %s2862_s8 }
 0x269   : > { %v2455_v10 = vpop.permute.xlu0 %2454 }
 0x26a   : > { %v3054_v11 = vunpack.i.h.bf16 %v2455_v10  ;;  %v2456_v12 = vunpack.i.l.bf16 %v2455_v10 }
 0x26c   : > { %v3058_v13 = vsel %vm297_vm0, %v2456_v12, %v3054_v11 }
 0x26d   : > { %v2460_v15 = vpop.permute.xlu1 %2459  ;;  %v3062_v16 = vpack.i.bf16 %v3054_v11, %v3058_v13 }
 0x26e   : > { %v3064_v17 = vunpack.i.h.bf16 %v2460_v15  ;;  %v2461_v18 = vunpack.i.l.bf16 %v2460_v15 }
 0x26f   : > { %2514 = vrot.lane.b32.xlu0 %v3062_v16, %s2862_s8 }
 0x270   : > { %v3070_v19 = vsel %vm297_vm0, %v2461_v18, %v3064_v17 }
 0x271   : > { %v2465_v20 = vpop.permute.xlu1 %2464  ;;  %v2470_v21 = vpop.permute.xlu0 %2469  ;;  %v3074_v22 = vpack.i.bf16 %v3064_v17, %v3070_v19 }
 0x272   : > { %v3076_v23 = vunpack.i.h.bf16 %v2465_v20  ;;  %v2466_v24 = vunpack.i.l.bf16 %v2465_v20  ;;  %v3078_v25 = vunpack.i.h.bf16 %v2470_v21  ;;  %v2471_v26 = vunpack.i.l.bf16 %v2470_v21 }
 0x273   : > { %2519 = vrot.lane.b32.xlu1 %v3074_v22, %s2862_s8 }
 0x274   : > { %v3084_v27 = vsel %vm601_vm4, %v2466_v24, %v3076_v23  ;;  %v3088_v28 = vsel %vm297_vm0, %v2471_v26, %v3078_v25  ;;  %v2243_v29 = vpack.c.bf16 %v3078_v25, %v3064_v17 }
 0x275   : > { %v2485_v30 = vpop.permute.xlu1 %2484  ;;  %v2475_v31 = vpop.permute.xlu0 %2474  ;;  %v3094_v32 = vpack.i.bf16 %v3076_v23, %v3084_v27  ;;  %v3098_v33 = vpack.i.bf16 %v3078_v25, %v3088_v28  ;;  %v2245_v38 = vpack.c.bf16 %v3088_v28, %v3070_v19  ;;  %v633_v28 = vld [vmem:[%s3439_s3] sm:$0xff] }
 0x276   : > { %v3100_v34 = vunpack.i.h.bf16 %v2485_v30  ;;  %v2486_v35 = vunpack.i.l.bf16 %v2485_v30  ;;  %v3102_v36 = vunpack.i.h.bf16 %v2475_v31  ;;  %v2476_v37 = vunpack.i.l.bf16 %v2475_v31 }
 0x277   : > { %2524 = vrot.lane.b32.xlu1 %v3094_v32, %s2862_s8  ;;  %2529 = vrot.lane.b32.xlu0 %v3098_v33, %s2862_s8 }
 0x278   : > { %v3112_v39 = vsel %vm601_vm4, %v2486_v35, %v3100_v34  ;;  %v3116_v40 = vsel %vm601_vm4, %v2476_v37, %v3102_v36  ;;  %v2247_v41 = vpack.c.bf16 %v3102_v36, %v3076_v23 }
 0x279   : > { %v2490_v42 = vpop.permute.xlu1 %2489  ;;  %v2480_v43 = vpop.permute.xlu0 %2479  ;;  %v2543_v44 = vpack.i.bf16 %v3100_v34, %v3112_v39  ;;  %v2533_v45 = vpack.i.bf16 %v3102_v36, %v3116_v40  ;;  %v2249_v50 = vpack.c.bf16 %v3116_v40, %v3084_v27 }
 0x27a   : > { %v3124_v46 = vunpack.i.h.bf16 %v2490_v42  ;;  %v2491_v47 = vunpack.i.l.bf16 %v2490_v42  ;;  %v3126_v48 = vunpack.i.h.bf16 %v2480_v43  ;;  %v2481_v49 = vunpack.i.l.bf16 %v2480_v43 }
 0x27b   : > { %2544 = vrot.lane.b32.xlu1 %v2543_v44, %s2862_s8  ;;  %2534 = vrot.lane.b32.xlu0 %v2533_v45, %s2862_s8 }
 0x27c   : > { %v3134_v51 = vsel %vm623_vm5, %v2491_v47, %v3124_v46  ;;  %v3138_v52 = vsel %vm623_vm5, %v2481_v49, %v3126_v48  ;;  %v2251_v54 = vpack.c.bf16 %v3126_v48, %v3100_v34 }
 0x27d   : > { %v2500_v55 = vpop.permute.xlu1 %2499  ;;  %v2495_v56 = vpop.permute.xlu0 %2494  ;;  %v2548_v57 = vpack.i.bf16 %v3124_v46, %v3134_v51  ;;  %v2538_v59 = vpack.i.bf16 %v3126_v48, %v3138_v52  ;;  %v2253_v63 = vpack.c.bf16 %v3138_v52, %v3112_v39 }
 0x27e   : > { %v3146_v60 = vunpack.i.h.bf16 %v2495_v56  ;;  %v2496_v62 = vunpack.i.l.bf16 %v2495_v56  ;;  %v2502_v1 = vunpack.i.h.bf16 %v2500_v55  ;;  %v2501_v2 = vunpack.i.l.bf16 %v2500_v55 }
 0x27f   : > { %2549 = vrot.lane.b32.xlu1 %v2548_v57, %s2862_s8  ;;  %2539 = vrot.lane.b32.xlu0 %v2538_v59, %s2862_s8 }
 0x280   : > { %v3154_v10 = vsel %vm623_vm5, %v2496_v62, %v3146_v60  ;;  %v2255_v12 = vpack.c.bf16 %v3146_v60, %v3124_v46  ;;  %v684_v30 = vsel %vm327_vm1, %v2501_v2, %v2502_v1 }
 0x281   : > { %v2505_v15 = vpop.permute.xlu0 %2504  ;;  %v2553_v18 = vpack.i.bf16 %v3146_v60, %v3154_v10  ;;  %v2257_v20 = vpack.c.bf16 %v3154_v10, %v3134_v51 }
 0x282   : > { %v2507_v21 = vunpack.i.h.bf16 %v2505_v15  ;;  %v2506_v24 = vunpack.i.l.bf16 %v2505_v15 }
 0x283   : > { %2559 = vrot.lane.b32.xlu1 %v3014_v4, %s2867_s10  ;;  %2554 = vrot.lane.b32.xlu0 %v2553_v18, %s2862_s8 }
 0x284   : > { %v2211_v26 = vpack.c.bf16 %v2507_v21, %v2502_v1  ;;  %v685_v31 = vsel %vm327_vm1, %v2506_v24, %v2507_v21 }
 0x285   : > { %v2213_v35 = vpack.c.bf16 %v685_v31, %v684_v30 }
 0x286   : > { %2212 = vmatprep.subr.bf16.mxu1 %v2211_v26 }
 0x287   : > { %2569 = vrot.lane.b32.xlu1 %v3032_v9, %s2867_s10  ;;  %2214 = vmatpush1.bf16.msra.mxu1 %v2213_v35 }
 0x288   : > { %2564 = vrot.lane.b32.xlu0 %v3022_v6, %s2867_s10 }
 0x28b   : > { %2579 = vrot.lane.b32.xlu1 %v3074_v22, %s2867_s10 }
 0x28c   : > { %2574 = vrot.lane.b32.xlu0 %v3062_v16, %s2867_s10 }
 0x28f   : > { %2584 = vrot.lane.b32.xlu1 %v3094_v32, %s2867_s10 }
 0x290   : > { %2589 = vrot.lane.b32.xlu0 %v3098_v33, %s2867_s10 }
 0x293   : > { %2604 = vrot.lane.b32.xlu1 %v2543_v44, %s2867_s10 }
 0x294   : > { %2594 = vrot.lane.b32.xlu0 %v2533_v45, %s2867_s10 }
 0x297   : > { %2609 = vrot.lane.b32.xlu1 %v2548_v57, %s2867_s10 }
 0x298   : > { %2599 = vrot.lane.b32.xlu0 %v2538_v59, %s2867_s10 }
 0x29b   : > { %2614 = vrot.lane.b32.xlu1 %v3014_v4, %s2868_s11  ;;  %v1194_v4 = vld [vmem:[%s3440_s4] sm:$0xff] }
 0x29c   : > { %2619 = vrot.lane.b32.xlu0 %v2553_v18, %s2867_s10 }
 0x29f   : > { %2629 = vrot.lane.b32.xlu1 %v3032_v9, %s2868_s11 }
 0x2a0   : > { %2624 = vrot.lane.b32.xlu0 %v3022_v6, %s2868_s11  ;;  %v2510_v6 = vpop.permute.xlu1 %2509 }
 0x2a1   : > { %v2512_v9 = vunpack.i.h.bf16 %v2510_v6 }
 0x2a3   : > { %2639 = vrot.lane.b32.xlu1 %v3074_v22, %s2868_s11 }
 0x2a4   : > { %2634 = vrot.lane.b32.xlu0 %v3062_v16, %s2868_s11  ;;  %v2511_v16 = vunpack.i.l.bf16 %v2510_v6 }
 0x2a6   : > { %v686_v42 = vsel %vm327_vm1, %v2511_v16, %v2512_v9 }
 0x2a7   : > { %2644 = vrot.lane.b32.xlu1 %v3094_v32, %s2868_s11 }
 0x2a8   : > { %2649 = vrot.lane.b32.xlu0 %v3098_v33, %s2868_s11 }
 0x2ab   : > { %2664 = vrot.lane.b32.xlu1 %v2543_v44, %s2868_s11 }
 0x2ac   : > { %2654 = vrot.lane.b32.xlu0 %v2533_v45, %s2868_s11 }
 0x2af   : > { %2669 = vrot.lane.b32.xlu1 %v2548_v57, %s2868_s11 }
 0x2b0   : > { %2659 = vrot.lane.b32.xlu0 %v2538_v59, %s2868_s11 }
 0x2b3   : > { %1197 = vperm.xlu1 %2452, %v1194_v4  }
 0x2b4   : > { %2674 = vrot.lane.b32.xlu0 %v2553_v18, %s2868_s11 }
 0x2e1   : > { %v2515_v22 = vpop.permute.xlu0 %2514 }
 0x2e2   : > { %v2517_v32 = vunpack.i.h.bf16 %v2515_v22  ;;  %v2516_v33 = vunpack.i.l.bf16 %v2515_v22 }
 0x2e4   : > { %v2215_v37 = vpack.c.bf16 %v2517_v32, %v2512_v9  ;;  %v687_v43 = vsel %vm327_vm1, %v2516_v33, %v2517_v32 }
 0x2e5   : > { %v2520_v44 = vpop.permute.xlu1 %2519  ;;  %v2217_v45 = vpack.c.bf16 %v687_v43, %v686_v42 }
 0x2e6   : > { %2216 = vmatprep.subr.bf16.mxu1 %v2215_v37  ;;  %v2522_v47 = vunpack.i.h.bf16 %v2520_v44  ;;  %v2521_v49 = vunpack.i.l.bf16 %v2520_v44 }
 0x2e7   : > { %2218 = vmatpush1.bf16.msra.mxu1 %v2217_v45 }
 0x2e8   : > { %v688_v62 = vsel %vm327_vm1, %v2521_v49, %v2522_v47 }
 0x2e9   : > { %v2525_v55 = vpop.permute.xlu1 %2524  ;;  %v2530_v56 = vpop.permute.xlu0 %2529 }
 0x2ea   : > { %v2532_v57 = vunpack.i.h.bf16 %v2530_v56  ;;  %v2531_v59 = vunpack.i.l.bf16 %v2530_v56  ;;  %v2527_v1 = vunpack.i.h.bf16 %v2525_v55  ;;  %v2526_v2 = vunpack.i.l.bf16 %v2525_v55 }
 0x2ec   : > { %v2219_v15 = vpack.c.bf16 %v2532_v57, %v2522_v47  ;;  %v689_v18 = vsel %vm327_vm1, %v2531_v59, %v2532_v57  ;;  %v690_v9 = vsel %vm327_vm1, %v2526_v2, %v2527_v1 }
 0x2ed   : > { %v2545_v21 = vpop.permute.xlu1 %2544  ;;  %v2535_v24 = vpop.permute.xlu0 %2534  ;;  %v2221_v26 = vpack.c.bf16 %v689_v18, %v688_v62 }
 0x2ee   : > { %v2537_v30 = vunpack.i.h.bf16 %v2535_v24  ;;  %v2536_v31 = vunpack.i.l.bf16 %v2535_v24  ;;  %2220 = vmatprep.subr.bf16.mxu1 %v2219_v15  ;;  %v2547_v35 = vunpack.i.h.bf16 %v2545_v21  ;;  %v2546_v4 = vunpack.i.l.bf16 %v2545_v21  ;;  %v2024_v24 = vld [vmem:[%s3439_s3 + $0x8] sm:$0xff] }
 0x2ef   : > { %2222 = vmatpush1.bf16.msra.mxu1 %v2221_v26 }
 0x2f0   : > { %v2223_v6 = vpack.c.bf16 %v2537_v30, %v2527_v1  ;;  %v691_v16 = vsel %vm327_vm1, %v2536_v31, %v2537_v30  ;;  %v692_v43 = vsel %vm327_vm1, %v2546_v4, %v2547_v35  ;;  %v2239_v31 = vpack.c.bf16 %v3054_v11, %v3028_v8 }
 0x2f1   : > { %v2550_v22 = vpop.permute.xlu1 %2549  ;;  %v2540_v32 = vpop.permute.xlu0 %2539  ;;  %v2225_v33 = vpack.c.bf16 %v691_v16, %v690_v9 }
 0x2f2   : > { %v2542_v37 = vunpack.i.h.bf16 %v2540_v32  ;;  %v2541_v42 = vunpack.i.l.bf16 %v2540_v32  ;;  %2224 = vmatprep.subr.bf16.mxu1 %v2223_v6  ;;  %v2552_v44 = vunpack.i.h.bf16 %v2550_v22  ;;  %v2551_v45 = vunpack.i.l.bf16 %v2550_v22 }
 0x2f3   : > { %2226 = vmatpush1.bf16.msra.mxu1 %v2225_v33 }
 0x2f4   : > { %v2227_v47 = vpack.c.bf16 %v2542_v37, %v2547_v35  ;;  %v693_v49 = vsel %vm327_vm1, %v2541_v42, %v2542_v37  ;;  %v694_v2 = vsel %vm327_vm1, %v2551_v45, %v2552_v44  ;;  %v2241_v35 = vpack.c.bf16 %v3058_v13, %v3007_v0 }
 0x2f5   : > { %v2555_v55 = vpop.permute.xlu0 %2554  ;;  %v2229_v56 = vpack.c.bf16 %v693_v49, %v692_v43  ;;  %v2560_v62 = vpop.permute.xlu1 %2559 }
 0x2f6   : > { %v2557_v57 = vunpack.i.h.bf16 %v2555_v55  ;;  %v2556_v59 = vunpack.i.l.bf16 %v2555_v55  ;;  %2228 = vmatprep.subr.bf16.mxu1 %v2227_v47  ;;  %v2562_v11 = vunpack.i.h.bf16 %v2560_v62  ;;  %v2561_v13 = vunpack.i.l.bf16 %v2560_v62 }
 0x2f7   : > { %2230 = vmatpush1.bf16.msra.mxu1 %v2229_v56 }
 0x2f8   : > { %v2231_v1 = vpack.c.bf16 %v2557_v57, %v2552_v44  ;;  %v695_v15 = vsel %vm327_vm1, %v2556_v59, %v2557_v57 }
 0x2f9   : > { %v2233_v18 = vpack.c.bf16 %v695_v15, %v694_v2  ;;  %v2570_v26 = vpop.permute.xlu1 %2569 }
 0x2fa   : > { %v2565_v21 = vpop.permute.xlu0 %2564  ;;  %2232 = vmatprep.subr.bf16.mxu1 %v2231_v1  ;;  %v2572_v34 = vunpack.i.h.bf16 %v2570_v26  ;;  %v2571_v36 = vunpack.i.l.bf16 %v2570_v26 }
 0x2fb   : > { %2234 = vmatpush1.bf16.msra.mxu1 %v2233_v18  ;;  %v2566_v0 = vunpack.i.l.bf16 %v2565_v21 }
 0x2fc   : > { %2236 = vmatprep.subr.bf16.mxu1 %v2235_v7 }
 0x2fd   : > { %v2580_v5 = vpop.permute.xlu1 %2579 }
 0x2fe   : > { %v2575_v30 = vpop.permute.xlu0 %2574  ;;  %2025 = vmatmul.mubr.msk.f32.vlgmr.msra.gmra.mrb[0].mxu1 %vm720_vm6, %v2024_v24  ;;  %v2582_v51 = vunpack.i.h.bf16 %v2580_v5  ;;  %v2581_v52 = vunpack.i.l.bf16 %v2580_v5 }
 0x2ff   : > { %2238 = vmatpush1.bf16.msra.mxu1 %v2237_v61  ;;  %862 = vmatprep.mubr.f32.mxu1 %v2863_v14  ;;  %v2567_v61 = vunpack.i.h.bf16 %v2565_v21  ;;  %v2577_v23 = vunpack.i.h.bf16 %v2575_v30  ;;  %v2576_v25 = vunpack.i.l.bf16 %v2575_v30 }
 0x300   : > { %2240 = vmatprep.subr.bf16.mxu1 %v2239_v31  ;;  %v923_v6 = vsel %vm720_vm6, %v2581_v52, %v2582_v51 }
 0x301   : > { %v2585_v53 = vpop.permute.xlu1 %2584  ;;  %v2259_v17 = vpack.c.bf16 %v2567_v61, %v2562_v11  ;;  %v920_v19 = vsel %vm720_vm6, %v2566_v0, %v2567_v61  ;;  %v2263_v40 = vpack.c.bf16 %v2577_v23, %v2572_v34 }
 0x302   : > { %v2590_v3 = vpop.permute.xlu0 %2589  ;;  %v2587_v9 = vunpack.i.h.bf16 %v2585_v53  ;;  %v2586_v16 = vunpack.i.l.bf16 %v2585_v53 }
 0x303   : > { %2242 = vmatpush1.bf16.msra.mxu1 %v2241_v35  ;;  %v2592_v46 = vunpack.i.h.bf16 %v2590_v3  ;;  %v2591_v48 = vunpack.i.l.bf16 %v2590_v3 }
 0x304   : > { %2244 = vmatprep.subr.bf16.mxu1 %v2243_v29  ;;  %v919_v29 = vsel %vm720_vm6, %v2561_v13, %v2562_v11  ;;  %v925_v44 = vsel %vm720_vm6, %v2586_v16, %v2587_v9  ;;  %v2027_v13 = vld [vmem:[%s3439_s3 + $0x10] sm:$0xff] }
 0x305   : > { %v2605_v8 = vpop.permute.xlu1 %2604  ;;  %v924_v10 = vsel %vm720_vm6, %v2591_v48, %v2592_v46 }
 0x306   : > { %v2595_v7 = vpop.permute.xlu0 %2594  ;;  %v2269_v22 = vpack.c.bf16 %v924_v10, %v923_v6  ;;  %v2607_v45 = vunpack.i.h.bf16 %v2605_v8  ;;  %v2606_v47 = vunpack.i.l.bf16 %v2605_v8 }
 0x307   : > { %2246 = vmatpush1.bf16.msra.mxu1 %v2245_v38  ;;  %v2261_v38 = vpack.c.bf16 %v920_v19, %v919_v29 }
 0x308   : > { %2248 = vmatprep.subr.bf16.mxu1 %v2247_v41  ;;  %v922_v41 = vsel %vm720_vm6, %v2576_v25, %v2577_v23  ;;  %v927_v1 = vsel %vm720_vm6, %v2606_v47, %v2607_v45 }
 0x309   : > { %v2610_v39 = vpop.permute.xlu1 %2609 }
 0x30a   : > { %v2600_v58 = vpop.permute.xlu0 %2599  ;;  %v2612_v2 = vunpack.i.h.bf16 %v2610_v39  ;;  %v2611_v15 = vunpack.i.l.bf16 %v2610_v39 }
 0x30b   : > { %2250 = vmatpush1.bf16.msra.mxu1 %v2249_v50  ;;  %v921_v50 = vsel %vm720_vm6, %v2571_v36, %v2572_v34  ;;  %v2602_v37 = vunpack.i.h.bf16 %v2600_v58  ;;  %v2601_v42 = vunpack.i.l.bf16 %v2600_v58 }
 0x30c   : > { %2252 = vmatprep.subr.bf16.mxu1 %v2251_v54  ;;  %v2265_v54 = vpack.c.bf16 %v922_v41, %v921_v50  ;;  %v929_v3 = vsel %vm720_vm6, %v2611_v15, %v2612_v2 }
 0x30d   : > { %v2615_v4 = vpop.permute.xlu1 %2614  ;;  %v2275_v56 = vpack.c.bf16 %v2602_v37, %v2607_v45  ;;  %v928_v57 = vsel %vm720_vm6, %v2601_v42, %v2602_v37 }
 0x30e   : > { %v2620_v27 = vpop.permute.xlu0 %2619  ;;  %v2277_v18 = vpack.c.bf16 %v928_v57, %v927_v1  ;;  %v2617_v5 = vunpack.i.h.bf16 %v2615_v4 }
 0x30f   : > { %2254 = vmatpush1.bf16.msra.mxu1 %v2253_v63  ;;  %v2267_v63 = vpack.c.bf16 %v2592_v46, %v2582_v51  ;;  %v2622_v59 = vunpack.i.h.bf16 %v2620_v27  ;;  %v2621_v62 = vunpack.i.l.bf16 %v2620_v27 }
 0x310   : > { %2256 = vmatprep.subr.bf16.mxu1 %v2255_v12  ;;  %v2597_v12 = vunpack.i.h.bf16 %v2595_v7 }
 0x311   : > { %v2630_v55 = vpop.permute.xlu1 %2629  ;;  %v2279_v24 = vpack.c.bf16 %v2622_v59, %v2612_v2  ;;  %v930_v26 = vsel %vm720_vm6, %v2621_v62, %v2622_v59  ;;  %v2029_v2 = vld [vmem:[%s3439_s3 + $0x18] sm:$0xff] }
 0x312   : > { %v2625_v60 = vpop.permute.xlu0 %2624  ;;  %v2271_v32 = vpack.c.bf16 %v2597_v12, %v2587_v9  ;;  %v2281_v53 = vpack.c.bf16 %v930_v26, %v929_v3  ;;  %v2632_v19 = vunpack.i.h.bf16 %v2630_v55  ;;  %v2631_v23 = vunpack.i.l.bf16 %v2630_v55 }
 0x313   : > { %2258 = vmatpush1.bf16.msra.mxu1 %v2257_v20  ;;  %v2596_v20 = vunpack.i.l.bf16 %v2595_v7  ;;  %v2627_v30 = vunpack.i.h.bf16 %v2625_v60  ;;  %v2626_v31 = vunpack.i.l.bf16 %v2625_v60  ;;  %v2616_v7 = vunpack.i.l.bf16 %v2615_v4 }
 0x314   : > { %2260 = vmatprep.subr.bf16.mxu1 %v2259_v17 }
 0x315   : > { %v926_v33 = vsel %vm720_vm6, %v2596_v20, %v2597_v12  ;;  %v2640_v35 = vpop.permute.xlu1 %2639  ;;  %v2283_v58 = vpack.c.bf16 %v2627_v30, %v2617_v5  ;;  %v1083_v61 = vsel %vm1081_vm7, %v2626_v31, %v2627_v30  ;;  %v1082_v17 = vsel %vm1081_vm7, %v2616_v7, %v2617_v5 }
 0x316   : > { %2026 = vmatmul.mubr.msk.f32.vlgmr.msra.gmra.mrb[0].mxu1 %vm720_vm6, %v633_v28  ;;  %v2635_v43 = vpop.permute.xlu0 %2634  ;;  %v2273_v49 = vpack.c.bf16 %v926_v33, %v925_v44  ;;  %v2285_v25 = vpack.c.bf16 %v1083_v61, %v1082_v17  ;;  %v2642_v39 = vunpack.i.h.bf16 %v2640_v35 }
 0x317   : > { %2262 = vmatpush1.bf16.msra.mxu1 %v2261_v38  ;;  %1022 = vmatprep.mubr.f32.mxu1 %v2863_v14  ;;  %v2637_v0 = vunpack.i.h.bf16 %v2635_v43  ;;  %v2636_v8 = vunpack.i.l.bf16 %v2635_v43  ;;  %v1084_v38 = vsel %vm1081_vm7, %v2631_v23, %v2632_v19 }
 0x318   : > { %2264 = vmatprep.subr.bf16.mxu1 %v2263_v40  ;;  %v2641_v40 = vunpack.i.l.bf16 %v2640_v35 }
 0x319   : > { %v2645_v27 = vpop.permute.xlu1 %2644  ;;  %v2287_v28 = vpack.c.bf16 %v2637_v0, %v2632_v19  ;;  %v1085_v29 = vsel %vm1081_vm7, %v2636_v8, %v2637_v0 }
 0x31a   : > { %v2650_v21 = vpop.permute.xlu0 %2649  ;;  %v2289_v41 = vpack.c.bf16 %v1085_v29, %v1084_v38  ;;  %v1086_v60 = vsel %vm1081_vm7, %v2641_v40, %v2642_v39  ;;  %v2646_v10 = vunpack.i.l.bf16 %v2645_v27 }
 0x31b   : > { %2266 = vmatpush1.bf16.msra.mxu1 %v2265_v54  ;;  %v2652_v34 = vunpack.i.h.bf16 %v2650_v21  ;;  %v2651_v36 = vunpack.i.l.bf16 %v2650_v21 }
 0x31c   : > { %2268 = vmatprep.subr.bf16.mxu1 %v2267_v63  ;;  %v2647_v63 = vunpack.i.h.bf16 %v2645_v27 }
 0x31d   : > { %v2291_v48 = vpack.c.bf16 %v2652_v34, %v2642_v39  ;;  %v1087_v50 = vsel %vm1081_vm7, %v2651_v36, %v2652_v34  ;;  %v2665_v54 = vpop.permute.xlu1 %2664 }
 0x31e   : > { %v2655_v11 = vpop.permute.xlu0 %2654  ;;  %v1088_v16 = vsel %vm1081_vm7, %v2646_v10, %v2647_v63 }
 0x31f   : > { %2270 = vmatpush1.bf16.msra.mxu1 %v2269_v22  ;;  %v2657_v51 = vunpack.i.h.bf16 %v2655_v11  ;;  %v2656_v52 = vunpack.i.l.bf16 %v2655_v11  ;;  %v2667_v22 = vunpack.i.h.bf16 %v2665_v54 }
 0x320   : > { %2272 = vmatprep.subr.bf16.mxu1 %v2271_v32  ;;  %v2666_v32 = vunpack.i.l.bf16 %v2665_v54  ;;  %v1936_v54 = vld [vmem:[%s3442_s6 + $0x8] sm:$0x3] }
 0x321   : > { %v2295_v12 = vpack.c.bf16 %v2657_v51, %v2647_v63  ;;  %v1089_v20 = vsel %vm1081_vm7, %v2656_v52, %v2657_v51  ;;  %v2670_v37 = vpop.permute.xlu1 %2669  ;;  %v1935_v52 = vld [vmem:[%s3442_s6] sm:$0xff] }
 0x322   : > { %v2660_v46 = vpop.permute.xlu0 %2659  ;;  %v2297_v33 = vpack.c.bf16 %v1089_v20, %v1088_v16  ;;  %v1090_v47 = vsel %vm1081_vm7, %v2666_v32, %v2667_v22  ;;  %v2671_v55 = vunpack.i.l.bf16 %v2670_v37 }
 0x323   : > { %2274 = vmatpush1.bf16.msra.mxu1 %v2273_v49  ;;  %v2662_v4 = vunpack.i.h.bf16 %v2660_v46  ;;  %v2661_v6 = vunpack.i.l.bf16 %v2660_v46  ;;  %v2672_v49 = vunpack.i.h.bf16 %v2670_v37 }
 0x324   : > { %2276 = vmatprep.subr.bf16.mxu1 %v2275_v56 }
 0x325   : > { %v2299_v42 = vpack.c.bf16 %v2662_v4, %v2667_v22  ;;  %v1091_v43 = vsel %vm1081_vm7, %v2661_v6, %v2662_v4  ;;  %v1092_v62 = vsel %vm1081_vm7, %v2671_v55, %v2672_v49 }
 0x326   : > { %v2675_v9 = vpop.permute.xlu0 %2674  ;;  %v2301_v56 = vpack.c.bf16 %v1091_v43, %v1090_v47 }
 0x327   : > { %2278 = vmatpush1.bf16.msra.mxu1 %v2277_v18  ;;  %v2677_v44 = vunpack.i.h.bf16 %v2675_v9  ;;  %v2676_v45 = vunpack.i.l.bf16 %v2675_v9 }
 0x328   : > { %2280 = vmatprep.subr.bf16.mxu1 %v2279_v24 }
 0x329   : > { %v2303_v57 = vpack.c.bf16 %v2677_v44, %v2672_v49  ;;  %v1093_v59 = vsel %vm1081_vm7, %v2676_v45, %v2677_v44 }
 0x32a   : > { %v2305_v1 = vpack.c.bf16 %v1093_v59, %v1092_v62 }
 0x32b   : > { %2282 = vmatpush1.bf16.msra.mxu1 %v2281_v53 }
 0x32c   : > { %2284 = vmatprep.subr.bf16.mxu1 %v2283_v58 }
 0x32e   : > { %2028 = vmatmul.mubr.msk.f32.vlgmr.msra.gmra.mrb[0].mxu1 %vm720_vm6, %v2027_v13 }
 0x32f   : > { %2286 = vmatpush1.bf16.msra.mxu1 %v2285_v25  ;;  %1185 = vmatprep.mubr.f32.mxu1 %v2863_v14  ;;  %v2293_v14 = vpack.c.bf16 %v1087_v50, %v1086_v60 }
 0x330   : > { %2288 = vmatprep.subr.bf16.mxu1 %v2287_v28 }
 0x332   : > { %v1198_v15 = vpop.permute.xlu1 %1197 }
 0x333   : > { %2290 = vmatpush1.bf16.msra.mxu1 %v2289_v41  ;;  %v2031_v41 = vld [vmem:[%s3441_s5 + $0x10] sm:$0xff] }
 0x334   : > { %2292 = vmatprep.subr.bf16.mxu1 %v2291_v48  ;;  %2117 = vmatprep.mubr.msk.f32.mxu0 %vm1283_vm11, %v2031_v41 }
 0x337   : > { %2294 = vmatpush1.bf16.msra.mxu1 %v2293_v14 }
 0x338   : > { %2296 = vmatprep.subr.bf16.mxu1 %v2295_v12 }
 0x33b   : > { %2298 = vmatpush1.bf16.msra.mxu1 %v2297_v33 }
 0x33c   : > { %2300 = vmatprep.subr.bf16.mxu1 %v2299_v42 }
 0x33f   : > { %2302 = vmatpush1.bf16.msra.mxu1 %v2301_v56 }
 0x340   : > { %2304 = vmatprep.subr.bf16.mxu1 %v2303_v57 }
 0x343   : > { %2306 = vmatpush1.bf16.msra.mxu1 %v2305_v1 }
 0x346   : > { %2030 = vmatmul.mubr.msk.f32.vlgmr.msra.gmra.mrb[0].mxu1 %vm720_vm6, %v2029_v2 }
 0x419   : > { %v1187_v18 = vpop.f32.mrb[0].mxu1 }
 0x41a   : > { %v3293_v21 = vadd.f32 %v1198_v15, %v1187_v18  ;;  %v1189_v24 = vpop.f32.mrb[1].mxu1 }
 0x41b   : > { %v1201_v26 = vadd.f32 %v1198_v15, %v1189_v24 }
 0x41d   : > { %1204 = vst.msk [vmem:[#allocation3 + $0x8] sm:$0xff] %vm1203_vm8, %v1201_v26 }
 0x424   : > { %v1207_v30 = vld [vmem:[#allocation3 + $0x8] sm:$0xff] }
 0x425   : > { %v3296_v31 = vpack.i.bf16 %v1207_v30, %v3293_v21  ;;  %v2032_v30 = vld [vmem:[%s3441_s5 + $0x18] sm:$0x3] }
 0x427   : > { %2684 = vrot.lane.b32.xlu1 %v3296_v31, %s2865_s29  ;;  %2679 = vrot.lane.b32.xlu0 %v3296_v31, %s2861_s30 }
 0x42b   : > { %2694 = vrot.lane.b32.xlu1 %v3296_v31, %s2869_s22  ;;  %2689 = vrot.lane.b32.xlu0 %v3296_v31, %s2866_s9 }
 0x42f   : > { %2704 = vrot.lane.b32.xlu1 %v3296_v31, %s2862_s8  ;;  %2699 = vrot.lane.b32.xlu0 %v3296_v31, %s2870_s23 }
 0x499   : > { %v2685_v35 = vpop.permute.xlu1 %2684  ;;  %v2680_v3 = vpop.permute.xlu0 %2679 }
 0x49a   : > { %v2687_v5 = vunpack.i.h.bf16 %v2685_v35  ;;  %v2686_v7 = vunpack.i.l.bf16 %v2685_v35  ;;  %v2682_v53 = vunpack.i.h.bf16 %v2680_v3  ;;  %v2681_v58 = vunpack.i.l.bf16 %v2680_v3  ;;  %v1242_v3 = vld [vmem:[%s3441_s5] sm:$0xff] }
 0x49c   : > { %v1220_v61 = vsel %vm601_vm4, %v2686_v7, %v2687_v5  ;;  %v3310_v0 = vsel %vm297_vm0, %v2681_v58, %v2682_v53 }
 0x49d   : > { %v2695_v8 = vpop.permute.xlu1 %2694  ;;  %v2690_v11 = vpop.permute.xlu0 %2689  ;;  %v2713_v13 = vpack.i.bf16 %v2687_v5, %v1220_v61  ;;  %v2708_v17 = vpack.i.bf16 %v2682_v53, %v3310_v0  ;;  %v2319_v26 = vpack.c.bf16 %v3310_v0, %v3293_v21 }
 0x49e   : > { %v2697_v19 = vunpack.i.h.bf16 %v2695_v8  ;;  %v2696_v23 = vunpack.i.l.bf16 %v2695_v8  ;;  %v2692_v25 = vunpack.i.h.bf16 %v2690_v11  ;;  %v2691_v27 = vunpack.i.l.bf16 %v2690_v11 }
 0x49f   : > { %2714 = vrot.lane.b32.xlu1 %v2713_v13, %s2862_s8  ;;  %2709 = vrot.lane.b32.xlu0 %v2708_v17, %s2862_s8 }
 0x4a0   : > { %v1233_v28 = vsel %vm1232_vm9, %v2696_v23, %v2697_v19  ;;  %v1226_v29 = vsel %vm623_vm5, %v2691_v27, %v2692_v25 }
 0x4a1   : > { %v2700_v34 = vpop.permute.xlu0 %2699  ;;  %v2723_v36 = vpack.i.bf16 %v2697_v19, %v1233_v28  ;;  %v2718_v38 = vpack.i.bf16 %v2692_v25, %v1226_v29  ;;  %v3322_v50 = vpack.c.bf16 %v1226_v29, %v1220_v61  ;;  %v2705_v60 = vpop.permute.xlu1 %2704 }
 0x4a2   : > { %v2702_v39 = vunpack.i.h.bf16 %v2700_v34  ;;  %v2701_v40 = vunpack.i.l.bf16 %v2700_v34  ;;  %v2707_v63 = vunpack.i.h.bf16 %v2705_v60  ;;  %v2706_v10 = vunpack.i.l.bf16 %v2705_v60  ;;  %v1243_v34 = vld [vmem:[%s3441_s5 + $0x8] sm:$0x3] }
 0x4a3   : > { %2724 = vrot.lane.b32.xlu1 %v2723_v36, %s2862_s8  ;;  %2719 = vrot.lane.b32.xlu0 %v2718_v38, %s2862_s8 }
 0x4a4   : > { %v1240_v46 = vsel %vm1239_vm10, %v2701_v40, %v2702_v39  ;;  %v1271_v16 = vsel %vm327_vm1, %v2706_v10, %v2707_v63  ;;  %v2037_v40 = vld [vmem:[%s3441_s5 + $0x20] sm:$0xff] }
 0x4a5   : > { %v2728_v48 = vpack.i.bf16 %v2702_v39, %v1240_v46  ;;  %v3324_v51 = vpack.c.bf16 %v1240_v46, %v1233_v28 }
 0x4a7   : > { %2734 = vrot.lane.b32.xlu1 %v3296_v31, %s2867_s10  ;;  %2729 = vrot.lane.b32.xlu0 %v2728_v48, %s2862_s8  ;;  %s2871_s8 = smov 64  }
 0x4ab   : > { %2744 = vrot.lane.b32.xlu1 %v2713_v13, %s2867_s10  ;;  %2739 = vrot.lane.b32.xlu0 %v2708_v17, %s2867_s10 }
 0x4af   : > { %2754 = vrot.lane.b32.xlu1 %v2723_v36, %s2867_s10  ;;  %2749 = vrot.lane.b32.xlu0 %v2718_v38, %s2867_s10 }
 0x4b3   : > { %2759 = vrot.lane.b32.xlu1 %v3296_v31, %s2868_s11  ;;  %2764 = vrot.lane.b32.xlu0 %v2728_v48, %s2867_s10 }
 0x4b7   : > { %2774 = vrot.lane.b32.xlu1 %v2713_v13, %s2868_s11  ;;  %2769 = vrot.lane.b32.xlu0 %v2708_v17, %s2868_s11 }
 0x4bb   : > { %2784 = vrot.lane.b32.xlu1 %v2723_v36, %s2868_s11  ;;  %2779 = vrot.lane.b32.xlu0 %v2718_v38, %s2868_s11 }
 0x4bf   : > { %2789 = vrot.lane.b32.xlu1 %v3296_v31, %s2871_s8  ;;  %2794 = vrot.lane.b32.xlu0 %v2728_v48, %s2868_s11 }
 0x4c3   : > { %2804 = vrot.lane.b32.xlu1 %v2713_v13, %s2871_s8  ;;  %2799 = vrot.lane.b32.xlu0 %v2708_v17, %s2871_s8 }
 0x4c7   : > { %2814 = vrot.lane.b32.xlu1 %v2723_v36, %s2871_s8  ;;  %2809 = vrot.lane.b32.xlu0 %v2718_v38, %s2871_s8 }
 0x4cb   : > { %2819 = vrot.lane.b32.xlu1 %v3296_v31, %s2872_s27  ;;  %2824 = vrot.lane.b32.xlu0 %v2728_v48, %s2871_s8 }
 0x4cf   : > { %2834 = vrot.lane.b32.xlu1 %v2713_v13, %s2872_s27  ;;  %2829 = vrot.lane.b32.xlu0 %v2708_v17, %s2872_s27 }
 0x4d3   : > { %2844 = vrot.lane.b32.xlu1 %v2723_v36, %s2872_s27  ;;  %2839 = vrot.lane.b32.xlu0 %v2718_v38, %s2872_s27 }
 0x4d7   : > { %1939 = vperm.xlu1 %2452, %v1935_v52   ;;  %2849 = vrot.lane.b32.xlu0 %v2728_v48, %s2872_s27 }
 0x4db   : > { %1944 = vperm.xlu0 %2451, %v1936_v54  }
 0x511   : > { %v2715_v14 = vpop.permute.xlu1 %2714  ;;  %v2710_v12 = vpop.permute.xlu0 %2709 }
 0x512   : > { %v2712_v20 = vunpack.i.h.bf16 %v2710_v12  ;;  %v2711_v4 = vunpack.i.l.bf16 %v2710_v12  ;;  %v2717_v6 = vunpack.i.h.bf16 %v2715_v14  ;;  %v2716_v9 = vunpack.i.l.bf16 %v2715_v14 }
 0x514   : > { %v1272_v22 = vsel %vm327_vm1, %v2711_v4, %v2712_v20  ;;  %v1273_v47 = vsel %vm327_vm1, %v2716_v9, %v2717_v6 }
 0x515   : > { %v2725_v32 = vpop.permute.xlu1 %2724  ;;  %v2720_v33 = vpop.permute.xlu0 %2719  ;;  %v2307_v37 = vpack.c.bf16 %v1272_v22, %v1271_v16 }
 0x516   : > { %v2722_v42 = vunpack.i.h.bf16 %v2720_v33  ;;  %v2721_v43 = vunpack.i.l.bf16 %v2720_v33  ;;  %v2727_v44 = vunpack.i.h.bf16 %v2725_v32  ;;  %v2726_v45 = vunpack.i.l.bf16 %v2725_v32 }
 0x517   : > { %2308 = vmatprep.subr.bf16.mxu0 %v2307_v37 }
 0x518   : > { %2310 = vmatpush3.bf16.msra.mxu0 %v2307_v37  ;;  %v1274_v49 = vsel %vm327_vm1, %v2721_v43, %v2722_v42  ;;  %v1275_v1 = vsel %vm327_vm1, %v2726_v45, %v2727_v44  ;;  %v2038_v45 = vld [vmem:[%s3441_s5 + $0x28] sm:$0x3] }
 0x519   : > { %v2735_v55 = vpop.permute.xlu1 %2734  ;;  %v2730_v56 = vpop.permute.xlu0 %2729  ;;  %v2311_v57 = vpack.c.bf16 %v1274_v49, %v1273_v47 }
 0x51a   : > { %v2732_v59 = vunpack.i.h.bf16 %v2730_v56  ;;  %v2731_v62 = vunpack.i.l.bf16 %v2730_v56  ;;  %v2737_v58 = vunpack.i.h.bf16 %v2735_v55  ;;  %v2736_v61 = vunpack.i.l.bf16 %v2735_v55  ;;  %v2041_v55 = vld [vmem:[%s3441_s5 + $0x30] sm:$0xff] }
 0x51b   : > { %2312 = vmatprep.subr.bf16.mxu0 %v2311_v57 }
 0x51c   : > { %2314 = vmatpush3.bf16.msra.mxu0 %v2311_v57  ;;  %v1276_v2 = vsel %vm327_vm1, %v2731_v62, %v2732_v59  ;;  %v1473_v25 = vsel %vm720_vm6, %v2736_v61, %v2737_v58 }
 0x51d   : > { %v2745_v15 = vpop.permute.xlu1 %2744  ;;  %v2740_v18 = vpop.permute.xlu0 %2739  ;;  %v2315_v24 = vpack.c.bf16 %v1276_v2, %v1275_v1 }
 0x51e   : > { %v2742_v5 = vunpack.i.h.bf16 %v2740_v18  ;;  %v2741_v7 = vunpack.i.l.bf16 %v2740_v18  ;;  %v2747_v19 = vunpack.i.h.bf16 %v2745_v15  ;;  %v2746_v23 = vunpack.i.l.bf16 %v2745_v15 }
 0x51f   : > { %2316 = vmatprep.subr.bf16.mxu0 %v2315_v24 }
 0x520   : > { %2318 = vmatpush3.bf16.msra.mxu0 %v2315_v24  ;;  %v1474_v11 = vsel %vm720_vm6, %v2741_v7, %v2742_v5  ;;  %v1475_v48 = vsel %vm720_vm6, %v2746_v23, %v2747_v19  ;;  %v2045_v23 = vld [vmem:[%s3441_s5 + $0x40] sm:$0xff] }
 0x521   : > { %v2755_v31 = vpop.permute.xlu1 %2754  ;;  %v2750_v35 = vpop.permute.xlu0 %2749  ;;  %2320 = vmatprep.subr.bf16.mxu0 %v2319_v26  ;;  %v2331_v27 = vpack.c.bf16 %v1474_v11, %v1473_v25 }
 0x522   : > { %v2752_v0 = vunpack.i.h.bf16 %v2750_v35  ;;  %v2751_v8 = vunpack.i.l.bf16 %v2750_v35  ;;  %v2757_v41 = vunpack.i.h.bf16 %v2755_v31  ;;  %v2756_v46 = vunpack.i.l.bf16 %v2755_v31 }
 0x523   : > { %2118 = vmatmul.mubr.msk.f32.vlgmr.msra.gmra.mrb[6].mxu0 %vm1283_vm11, %v2032_v30 }
 0x524   : > { %2322 = vmatpush3.bf16.msra.mxu0 %v2319_v26  ;;  %2132 = vmatprep.mubr.msk.f32.mxu0 %vm1283_vm11, %v1242_v3  ;;  %v1476_v36 = vsel %vm720_vm6, %v2751_v8, %v2752_v0  ;;  %v1477_v12 = vsel %vm720_vm6, %v2756_v46, %v2757_v41 }
 0x525   : > { %v2760_v21 = vpop.permute.xlu1 %2759  ;;  %v2765_v53 = vpop.permute.xlu0 %2764  ;;  %2324 = vmatprep.subr.bf16.mxu0 %v3322_v50 }
 0x526   : > { %v2767_v28 = vunpack.i.h.bf16 %v2765_v53  ;;  %v2766_v29 = vunpack.i.l.bf16 %v2765_v53  ;;  %v2762_v10 = vunpack.i.h.bf16 %v2760_v21  ;;  %v2761_v14 = vunpack.i.l.bf16 %v2760_v21 }
 0x528   : > { %2326 = vmatpush3.bf16.msra.mxu0 %v3322_v50  ;;  %v2335_v50 = vpack.c.bf16 %v1476_v36, %v1475_v48  ;;  %v1478_v54 = vsel %vm720_vm6, %v2766_v29, %v2767_v28  ;;  %v1595_v33 = vsel %vm1081_vm7, %v2761_v14, %v2762_v10 }
 0x529   : > { %v2775_v13 = vpop.permute.xlu1 %2774  ;;  %v2770_v17 = vpop.permute.xlu0 %2769  ;;  %2328 = vmatprep.subr.bf16.mxu0 %v3324_v51  ;;  %v2339_v20 = vpack.c.bf16 %v1478_v54, %v1477_v12 }
 0x52a   : > { %v2771_v52 = vunpack.i.l.bf16 %v2770_v17  ;;  %v2777_v22 = vunpack.i.h.bf16 %v2775_v13  ;;  %v2776_v32 = vunpack.i.l.bf16 %v2775_v13 }
 0x52c   : > { %2330 = vmatpush3.bf16.msra.mxu0 %v3324_v51  ;;  %v2772_v51 = vunpack.i.h.bf16 %v2770_v17  ;;  %v1597_v59 = vsel %vm1081_vm7, %v2776_v32, %v2777_v22  ;;  %v2042_v17 = vld [vmem:[%s3441_s5 + $0x38] sm:$0x3]  ;;  %v2049_v22 = vld [vmem:[%s3441_s5 + $0x50] sm:$0xff] }
 0x52d   : > { %v2785_v38 = vpop.permute.xlu1 %2784  ;;  %v2780_v39 = vpop.permute.xlu0 %2779  ;;  %2332 = vmatprep.subr.bf16.mxu0 %v2331_v27 }
 0x52e   : > { %v2782_v4 = vunpack.i.h.bf16 %v2780_v39  ;;  %v2781_v6 = vunpack.i.l.bf16 %v2780_v39  ;;  %v1596_v9 = vsel %vm1081_vm7, %v2771_v52, %v2772_v51  ;;  %v2787_v56 = vunpack.i.h.bf16 %v2785_v38 }
 0x52f   : > { %2133 = vmatmul.mubr.msk.f32.vlgmr.msra.gmra.mrb[6].mxu0 %vm1283_vm11, %v1243_v34  ;;  %v2343_v42 = vpack.c.bf16 %v1596_v9, %v1595_v33  ;;  %v2786_v57 = vunpack.i.l.bf16 %v2785_v38  ;;  %v2046_v9 = vld [vmem:[%s3441_s5 + $0x48] sm:$0x3] }
 0x530   : > { %2334 = vmatpush3.bf16.msra.mxu0 %v2331_v27  ;;  %2147 = vmatprep.mubr.msk.f32.mxu0 %vm1283_vm11, %v2037_v40  ;;  %v1598_v47 = vsel %vm1081_vm7, %v2781_v6, %v2782_v4 }
 0x531   : > { %v2790_v60 = vpop.permute.xlu1 %2789  ;;  %v2795_v63 = vpop.permute.xlu0 %2794  ;;  %2336 = vmatprep.subr.bf16.mxu0 %v2335_v50  ;;  %v2347_v62 = vpack.c.bf16 %v1598_v47, %v1597_v59  ;;  %v1599_v31 = vsel %vm1081_vm7, %v2786_v57, %v2787_v56  ;;  %v2050_v47 = vld [vmem:[%s3441_s5 + $0x58] sm:$0x3] }
 0x532   : > { %v2797_v43 = vunpack.i.h.bf16 %v2795_v63  ;;  %v2796_v44 = vunpack.i.l.bf16 %v2795_v63  ;;  %v2792_v26 = vunpack.i.h.bf16 %v2790_v60  ;;  %v2791_v30 = vunpack.i.l.bf16 %v2790_v60 }
 0x534   : > { %2338 = vmatpush3.bf16.msra.mxu0 %v2335_v50  ;;  %v1600_v15 = vsel %vm1081_vm7, %v2796_v44, %v2797_v43  ;;  %v1718_v61 = vsel %vm1717_vm12, %v2791_v30, %v2792_v26 }
 0x535   : > { %v2800_v16 = vpop.permute.xlu0 %2799  ;;  %2340 = vmatprep.subr.bf16.mxu0 %v2339_v20  ;;  %v2805_v37 = vpop.permute.xlu1 %2804  ;;  %v2351_v35 = vpack.c.bf16 %v1600_v15, %v1599_v31 }
 0x536   : > { %v2802_v1 = vunpack.i.h.bf16 %v2800_v16  ;;  %v2801_v2 = vunpack.i.l.bf16 %v2800_v16  ;;  %v2807_v53 = vunpack.i.h.bf16 %v2805_v37  ;;  %v2806_v58 = vunpack.i.l.bf16 %v2805_v37 }
 0x538   : > { %2342 = vmatpush3.bf16.msra.mxu0 %v2339_v20  ;;  %v1719_v7 = vsel %vm1717_vm12, %v2801_v2, %v2802_v1  ;;  %v1720_v28 = vsel %vm1717_vm12, %v2806_v58, %v2807_v53 }
 0x539   : > { %v2810_v49 = vpop.permute.xlu0 %2809  ;;  %2344 = vmatprep.subr.bf16.mxu0 %v2343_v42  ;;  %v2815_v18 = vpop.permute.xlu1 %2814  ;;  %v2355_v8 = vpack.c.bf16 %v1719_v7, %v1718_v61 }
 0x53a   : > { %v2812_v3 = vunpack.i.h.bf16 %v2810_v49  ;;  %v2811_v5 = vunpack.i.l.bf16 %v2810_v49  ;;  %v2817_v25 = vunpack.i.h.bf16 %v2815_v18  ;;  %v2816_v27 = vunpack.i.l.bf16 %v2815_v18 }
 0x53b   : > { %2148 = vmatmul.mubr.msk.f32.vlgmr.msra.gmra.mrb[6].mxu0 %vm1283_vm11, %v2038_v45 }
 0x53c   : > { %2346 = vmatpush3.bf16.msra.mxu0 %v2343_v42  ;;  %2162 = vmatprep.mubr.msk.f32.mxu0 %vm1283_vm11, %v2041_v55  ;;  %v1721_v19 = vsel %vm1717_vm12, %v2811_v5, %v2812_v3  ;;  %v1722_v48 = vsel %vm1717_vm12, %v2816_v27, %v2817_v25 }
 0x53d   : > { %v2825_v24 = vpop.permute.xlu0 %2824  ;;  %2348 = vmatprep.subr.bf16.mxu0 %v2347_v62  ;;  %v2820_v0 = vpop.permute.xlu1 %2819  ;;  %v2359_v34 = vpack.c.bf16 %v1721_v19, %v1720_v28 }
 0x53e   : > { %v2827_v11 = vunpack.i.h.bf16 %v2825_v24  ;;  %v2826_v13 = vunpack.i.l.bf16 %v2825_v24  ;;  %v2822_v41 = vunpack.i.h.bf16 %v2820_v0  ;;  %v2821_v46 = vunpack.i.l.bf16 %v2820_v0 }
 0x540   : > { %2350 = vmatpush3.bf16.msra.mxu0 %v2347_v62  ;;  %v1723_v39 = vsel %vm1717_vm12, %v2826_v13, %v2827_v11  ;;  %v1840_v14 = vsel %vm1283_vm11, %v2821_v46, %v2822_v41 }
 0x541   : > { %v2830_v21 = vpop.permute.xlu0 %2829  ;;  %2352 = vmatprep.subr.bf16.mxu0 %v2351_v35  ;;  %v2835_v40 = vpop.permute.xlu1 %2834  ;;  %v2363_v50 = vpack.c.bf16 %v1723_v39, %v1722_v48 }
 0x542   : > { %v2832_v36 = vunpack.i.h.bf16 %v2830_v21  ;;  %v2831_v38 = vunpack.i.l.bf16 %v2830_v21  ;;  %v2837_v63 = vunpack.i.h.bf16 %v2835_v40  ;;  %v2836_v10 = vunpack.i.l.bf16 %v2835_v40 }
 0x544   : > { %2354 = vmatpush3.bf16.msra.mxu0 %v2351_v35  ;;  %v1841_v54 = vsel %vm1283_vm11, %v2831_v38, %v2832_v36  ;;  %v1842_v37 = vsel %vm1283_vm11, %v2836_v10, %v2837_v63 }
 0x545   : > { %2356 = vmatprep.subr.bf16.mxu0 %v2355_v8  ;;  %v2840_v29 = vpop.permute.xlu0 %2839  ;;  %v2845_v12 = vpop.permute.xlu1 %2844  ;;  %v2367_v20 = vpack.c.bf16 %v1841_v54, %v1840_v14 }
 0x546   : > { %v2842_v51 = vunpack.i.h.bf16 %v2840_v29  ;;  %v2841_v52 = vunpack.i.l.bf16 %v2840_v29  ;;  %v2847_v32 = vunpack.i.h.bf16 %v2845_v12  ;;  %v2846_v33 = vunpack.i.l.bf16 %v2845_v12 }
 0x547   : > { %2163 = vmatmul.mubr.msk.f32.vlgmr.msra.gmra.mrb[6].mxu0 %vm1283_vm11, %v2042_v17 }
 0x548   : > { %2358 = vmatpush3.bf16.msra.mxu0 %v2355_v8  ;;  %2177 = vmatprep.mubr.msk.f32.mxu0 %vm1283_vm11, %v2045_v23  ;;  %v1843_v16 = vsel %vm1283_vm11, %v2841_v52, %v2842_v51  ;;  %v1844_v44 = vsel %vm1283_vm11, %v2846_v33, %v2847_v32 }
 0x549   : > { %2360 = vmatprep.subr.bf16.mxu0 %v2359_v34  ;;  %v2850_v60 = vpop.permute.xlu0 %2849  ;;  %v2371_v42 = vpack.c.bf16 %v1843_v16, %v1842_v37 }
 0x54a   : > { %v2852_v4 = vunpack.i.h.bf16 %v2850_v60  ;;  %v2851_v6 = vunpack.i.l.bf16 %v2850_v60 }
 0x54c   : > { %2362 = vmatpush3.bf16.msra.mxu0 %v2359_v34  ;;  %v1845_v43 = vsel %vm1283_vm11, %v2851_v6, %v2852_v4 }
 0x54d   : > { %2364 = vmatprep.subr.bf16.mxu0 %v2363_v50  ;;  %v2375_v45 = vpack.c.bf16 %v1845_v43, %v1844_v44 }
 0x550   : > { %2366 = vmatpush3.bf16.msra.mxu0 %v2363_v50 }
 0x551   : > { %2368 = vmatprep.subr.bf16.mxu0 %v2367_v20 }
 0x553   : > { %2178 = vmatmul.mubr.msk.f32.vlgmr.msra.gmra.mrb[6].mxu0 %vm1283_vm11, %v2046_v9 }
 0x554   : > { %2370 = vmatpush3.bf16.msra.mxu0 %v2367_v20  ;;  %2192 = vmatprep.mubr.msk.f32.mxu0 %vm1283_vm11, %v2049_v22 }
 0x555   : > { %2372 = vmatprep.subr.bf16.mxu0 %v2371_v42 }
 0x556   : > { %v1940_v56 = vpop.permute.xlu1 %1939 }
 0x558   : > { %2374 = vmatpush3.bf16.msra.mxu0 %v2371_v42 }
 0x559   : > { %2376 = vmatprep.subr.bf16.mxu0 %v2375_v45 }
 0x55a   : > { %v1945_v49 = vpop.permute.xlu0 %1944 }
 0x55c   : > { %2378 = vmatpush3.bf16.msra.mxu0 %v2375_v45 }
 0x55f   : > { %2193 = vmatmul.mubr.msk.f32.vlgmr.msra.gmra.mrb[6].mxu0 %vm1283_vm11, %v2050_v47 }
 0x632   : > { %v2194_v55 = vpop.f32.mrb[6].mxu0 }
 0x633   : > { %v1948_v57 = vadd.f32 %v2194_v55, %v1945_v49  ;;  %v1924_v59 = vpop.f32.mrb[7].mxu0 }
 0x634   : > { %v1947_v62 = vadd.f32 %v1940_v56, %v1924_v59 }
 0x635   : > { %1950 = vst [vmem:[%s278_s15 + $0x8] sm:$0x3] %v1948_v57 }
 0x636   : > { %1949 = vst [vmem:[%s278_s15] sm:$0xff] %v1947_v62 }
 0x637 PF: > { %s17_s24 = sadd.s32 1, %s2859_s24  }
 0x638   : > { %p14_p4 = scmp.ge.s32.totalorder %s17_s24, 4  }
 0x63a   :  { %16 = sbr.rel (!%p14_p4) target bundleno = 1 (0x1), region = 87 }

</bundles_post_ra>
